<compile_context>
chip_gen: v7x
topology: tpu7x:2x2x1
jax: 0.10.0
libtpu: 0.0.40
codegen_flags: <defaults>
</compile_context>

<pallas_src>
import jax
import jax.numpy as jnp
from jax.experimental import pallas as pl
from jax.experimental.pallas import tpu as pltpu

BN_EPS = 1e-5
POOL_PAD = 2            # nn.MaxPool1d(..., padding=2)
NEG_INF = -3.0e38       # finite stand-in for -inf padding (never reaches output:
                        # padding <= kernel//2 guarantees every window has real data)
MAX_ITEMS_PER_STEP = 8  # per-item work is statically unrolled inside one grid step


def _pool_len(L, P):
    return (L + 2 * POOL_PAD - P) // P + 1


# --------------------------------- wrapper -------------------------------------

def bapm_cnn_forward(x, params, filters, kernels, pools):
    """x: (B, L) float32.  Returns (B, L_final, filters[-1]) == cnn(x).transpose(1, 2)."""
    B, L0 = x.shape
    F1, F2, F3 = filters
    K1, K2, K3 = kernels
    P1, P2, P3 = pools
    MAXC = max(filters)

    Lc1 = L0 - K1 + 1
    Lp1 = _pool_len(Lc1, P1)
    Lc2 = Lp1 - K2 + 1
    Lp2 = _pool_len(Lc2, P2)
    Lc3 = Lp2 - K3 + 1
    Lp3 = _pool_len(Lc3, P3)

    # ---- batching: Bt items per grid step.  Keep >= 2 grid steps so both v7x
    # ---- TensorCores get work; cap Bt because items are statically unrolled.
    Bt = max(1, min(MAX_ITEMS_PER_STEP, (B + 1) // 2))
    G = -(-B // Bt)
    B_pad = G * Bt

    # ---- pack conv weights: (Cout, Cin, K) -> (K*Cin, Cout) bf16, pad lanes to
    # ---- MAXC, pad rows to a multiple of 16 (bf16 sublane packing) so every
    # ---- section starts at an aligned sublane offset.
    sections, offsets, row = [], [], 0
    for w in (params["w1"], params["w2"], params["w3"]):
        Cout, Cin, K = w.shape
        w2d = jnp.transpose(w, (2, 1, 0)).reshape(K * Cin, Cout)   # row = k*Cin + cin
        rpad = (-w2d.shape[0]) % 16
        sec = jnp.pad(w2d.astype(jnp.float32), ((0, rpad), (0, MAXC - Cout)))
        offsets.append(row)
        sections.append(sec)
        row += sec.shape[0]
    w_slab = jnp.concatenate(sections, axis=0).astype(jnp.bfloat16)   # (rows, MAXC)

    # ---- pack biases + folded BatchNorm scale/shift into one (9, MAXC) f32 slab
    def fold_bn(g, be, m, v):
        scale = g / jnp.sqrt(v + BN_EPS)
        return scale, be - m * scale

    vec_rows = []
    for i in (1, 2, 3):
        b = params[f"b{i}"]
        scale, shift = fold_bn(params[f"g{i}"], params[f"be{i}"],
                               params[f"m{i}"], params[f"v{i}"])
        for vr in (b, scale, shift):
            vec_rows.append(jnp.pad(vr.astype(jnp.float32), (0, MAXC - vr.shape[0])))
    v_slab = jnp.stack(vec_rows, axis=0)                              # (9, MAXC)

    # channels-last input, batch padded to a multiple of Bt
    x3 = jnp.pad(x.astype(jnp.float32), ((0, B_pad - B), (0, 0)))[:, :, None]

    # (weight row offset, vector row offset, K, Cin, Cout, P, Lconv) per stage
    cfg = (
        (offsets[0], 0, K1, 1, F1, P1, Lc1),
        (offsets[1], 3, K2, F1, F2, P2, Lc2),
        (offsets[2], 6, K3, F2, F3, P3, Lc3),
    )

    def kernel(x_ref, w_ref, v_ref, out_ref, sc1, sc2, sc3):
        scratches = (sc1, sc2, sc3)

        # Write ONLY the pad rows of each pool scratch (interior is fully
        # overwritten per item).  Done every step, not just program_id==0, so it
        # stays correct when the parallel grid axis is split across TensorCores.
        for sc, (_, _, _, _, Cout, _, Lc) in zip(scratches, cfg):
            pad_blk = jnp.full((POOL_PAD, Cout), NEG_INF, jnp.float32)
            sc[0:POOL_PAD, :] = pad_blk
            sc[Lc + POOL_PAD:Lc + 2 * POOL_PAD, :] = pad_blk

        def conv_relu_bn(xin, w_off, v_row, K, Cin, Cout):
            L = xin.shape[0]
            Lout = L - K + 1
            bias = v_ref[v_row:v_row + 1, 0:Cout]               # (1, Cout)
            scale = v_ref[v_row + 1:v_row + 2, 0:Cout]
            shift = v_ref[v_row + 2:v_row + 3, 0:Cout]
            if Cin == 1:
                # Single input channel: K tiny broadcast outer products on the VPU.
                wsec = w_ref[w_off:w_off + K, 0:Cout].astype(jnp.float32)   # (K, Cout)
                acc = jnp.zeros((Lout, Cout), jnp.float32)
                for dk in range(K):
                    acc = acc + xin[dk:dk + Lout, :] * wsec[dk:dk + 1, :]
            else:
                # im2col: concat the K shifted sublane slices along lanes, then do
                # ONE bf16 MXU matmul against the (K*Cin, Cout) weight section.
                cols = [xin[dk:dk + Lout, :] for dk in range(K)]            # (Lout, Cin) each
                im2col = jnp.concatenate(cols, axis=1).astype(jnp.bfloat16) # (Lout, K*Cin)
                wsec = w_ref[w_off:w_off + K * Cin, 0:Cout]                 # (K*Cin, Cout) bf16
                acc = jnp.dot(im2col, wsec, preferred_element_type=jnp.float32)
            acc = jnp.maximum(acc + bias, 0.0)                  # conv bias + ReLU
            return acc * scale + shift                          # folded BatchNorm (eval)

        def maxpool_pad2(y, P, sc, Lc):
            # MaxPool1d(kernel=P, stride=P, padding=POOL_PAD) via P strided
            # sublane reads of the (-inf padded) scratch buffer.
            Lout = (Lc + 2 * POOL_PAD - P) // P + 1
            sc[POOL_PAD:POOL_PAD + Lc, :] = y                   # interior rows only
            pooled = sc[pl.ds(0, Lout, stride=P), :]
            for t in range(1, P):
                pooled = jnp.maximum(pooled, sc[pl.ds(t, Lout, stride=P), :])
            return pooled

        for i in range(Bt):                                     # static unroll over items
            y = x_ref[i]                                        # (L0, 1) channels-last
            for stage, (w_off, v_row, K, Cin, Cout, P, Lc) in enumerate(cfg):
                y = conv_relu_bn(y, w_off, v_row, K, Cin, Cout)
                y = maxpool_pad2(y, P, scratches[stage], Lc)
            out_ref[i] = y                                      # (Lp3, F3)

    out_full = pl.pallas_call(
        kernel,
        out_shape=jax.ShapeDtypeStruct((B_pad, Lp3, F3), jnp.float32),
        grid_spec=pltpu.PrefetchScalarGridSpec(
            num_scalar_prefetch=0,
            grid=(G,),
            in_specs=[
                pl.BlockSpec((Bt, L0, 1), lambda g: (g, 0, 0)),
                pl.BlockSpec(w_slab.shape, lambda g: (0, 0)),   # resident weight slab
                pl.BlockSpec(v_slab.shape, lambda g: (0, 0)),   # resident vector slab
            ],
            out_specs=pl.BlockSpec((Bt, Lp3, F3), lambda g: (g, 0, 0)),
            scratch_shapes=[
                pltpu.VMEM((Lc1 + 2 * POOL_PAD, F1), jnp.float32),
                pltpu.VMEM((Lc2 + 2 * POOL_PAD, F2), jnp.float32),
                pltpu.VMEM((Lc3 + 2 * POOL_PAD, F3), jnp.float32),
            ],
        ),
        compiler_params=pltpu.CompilerParams(dimension_semantics=("parallel",)),
    )(x3, w_slab, v_slab)
    return out_full[:B]


# --------------------------- pure-JAX reference --------------------------------

def reference(x, p, pools):
    y = x[:, None, :]                                          # (B, 1, L)
    for i in (1, 2, 3):
        w, b = p[f"w{i}"], p[f"b{i}"]
        g, be, m, v = p[f"g{i}"], p[f"be{i}"], p[f"m{i}"], p[f"v{i}"]
        y = jax.lax.conv_general_dilated(
            y, w, window_strides=(1,), padding="VALID",
            dimension_numbers=("NCH", "OIH", "NCH"))
        y = y + b[None, :, None]
        y = jnp.maximum(y, 0.0)
        y = (y - m[None, :, None]) / jnp.sqrt(v[None, :, None] + BN_EPS) \
            * g[None, :, None] + be[None, :, None]
        P = pools[i - 1]
        y = jax.lax.reduce_window(
            y, -jnp.inf, jax.lax.max, (1, 1, P), (1, 1, P),
            ((0, 0), (0, 0), (POOL_PAD, POOL_PAD)))
    return jnp.transpose(y, (0, 2, 1))                         # (B, L_out, C)


# ----------------------------------- main ---------------------------------------

def make_params(key, filters, kernels):
    F1, F2, F3 = filters
    K1, K2, K3 = kernels
    ks = jax.random.split(key, 18)
    n, u = jax.random.normal, jax.random.uniform
    return {
        "w1": 0.3 * n(ks[0], (F1, 1, K1), jnp.float32),
        "b1": 0.1 * n(ks[1], (F1,), jnp.float32),
        "g1": 1.0 + 0.1 * n(ks[2], (F1,), jnp.float32),
        "be1": 0.1 * n(ks[3], (F1,), jnp.float32),
        "m1": 0.1 * n(ks[4], (F1,), jnp.float32),
        "v1": u(ks[5], (F1,), jnp.float32, 0.5, 1.5),
        "w2": 0.3 * n(ks[6], (F2, F1, K2), jnp.float32),
        "b2": 0.1 * n(ks[7], (F2,), jnp.float32),
        "g2": 1.0 + 0.1 * n(ks[8], (F2,), jnp.float32),
        "be2": 0.1 * n(ks[9], (F2,), jnp.float32),
        "m2": 0.1 * n(ks[10], (F2,), jnp.float32),
        "v2": u(ks[11], (F2,), jnp.float32, 0.5, 1.5),
        "w3": 0.3 * n(ks[12], (F3, F2, K3), jnp.float32),
        "b3": 0.1 * n(ks[13], (F3,), jnp.float32),
        "g3": 1.0 + 0.1 * n(ks[14], (F3,), jnp.float32),
        "be3": 0.1 * n(ks[15], (F3,), jnp.float32),
        "m3": 0.1 * n(ks[16], (F3,), jnp.float32),
        "v3": u(ks[17], (F3,), jnp.float32, 0.5, 1.5),
    }


if __name__ == "__main__":
    B, L = 4, 128
    filters = [8, 16, 32]
    kernels = [5, 5, 3]
    pools = [4, 4, 4]          # MaxPool1d requires padding (=2) <= kernel_size // 2

    key = jax.random.PRNGKey(0)
    kx, kp = jax.random.split(key)
    x = jax.random.normal(kx, (B, L), jnp.float32)
    params = make_params(kp, filters, kernels)

    out = bapm_cnn_forward(x, params, filters, kernels, pools)
    out = jax.block_until_ready(out)

    ref = jax.block_until_ready(reference(x, params, pools))
    assert out.shape == ref.shape, (out.shape, ref.shape)
    assert bool(jnp.all(jnp.isfinite(out)))
    # atol slightly relaxed vs. a pure-f32 kernel: conv weights / im2col operands
    # are bf16 on the MXU (accumulation stays f32).
    err = float(jnp.max(jnp.abs(out - ref)))
    assert jnp.allclose(out, ref, rtol=2e-2, atol=5e-2), err

    print("KERNEL_OK")
</pallas_src>

<mosaic_0001>
module attributes {stable_mosaic.version = 11 : i64} {
  func.func @kernel(%arg0: i32, %arg1: memref<2x128x1xf32, #tpu.memory_space<vmem>>, %arg2: memref<112x32xbf16, #tpu.memory_space<vmem>>, %arg3: memref<9x32xf32, #tpu.memory_space<vmem>>, %arg4: memref<2x2x32xf32, #tpu.memory_space<vmem>>, %arg5: memref<128x8xf32, #tpu.memory_space<vmem>>, %arg6: memref<32x16xf32, #tpu.memory_space<vmem>>, %arg7: memref<10x32xf32, #tpu.memory_space<vmem>>) attributes {dimension_semantics = [#tpu.dimension_semantics<parallel>], iteration_bounds = array<i64: 2>, scalar_prefetch = 0 : i64, scratch_operands = 3 : i64, tpu.core_type = #tpu.core_type<tc>, window_params = [{transform_indices = @transform_0, window_bounds = array<i64: 2, 128, 1>}, {pipeline_mode = #tpu.pipeline_mode<synchronous>, transform_indices = @transform_1, window_bounds = array<i64: 112, 32>}, {pipeline_mode = #tpu.pipeline_mode<synchronous>, transform_indices = @transform_2, window_bounds = array<i64: 9, 32>}, {transform_indices = @transform_3, window_bounds = array<i64: 2, 2, 32>}]} {
    %cst = arith.constant -3.000000e+38 : f32
    %0 = vector.broadcast %cst : f32 to vector<2x8xf32>
    %c0 = arith.constant 0 : index
    %c0_0 = arith.constant 0 : index
    %1 = vector.load %arg5[%c0, %c0_0] : memref<128x8xf32, #tpu.memory_space<vmem>>, vector<2x8xf32>
    tpu.vector_store %arg5[%c0, %c0_0], %0 {strides = array<i32>} : memref<128x8xf32, #tpu.memory_space<vmem>>, vector<2x8xf32>,
    %c126 = arith.constant 126 : index
    %c0_1 = arith.constant 0 : index
    %2 = vector.load %arg5[%c126, %c0_1] : memref<128x8xf32, #tpu.memory_space<vmem>>, vector<2x8xf32>
    tpu.vector_store %arg5[%c126, %c0_1], %0 {strides = array<i32>} : memref<128x8xf32, #tpu.memory_space<vmem>>, vector<2x8xf32>,
    %cst_2 = arith.constant -3.000000e+38 : f32
    %3 = vector.broadcast %cst_2 : f32 to vector<2x16xf32>
    %c0_3 = arith.constant 0 : index
    %c0_4 = arith.constant 0 : index
    %4 = vector.load %arg6[%c0_3, %c0_4] : memref<32x16xf32, #tpu.memory_space<vmem>>, vector<2x16xf32>
    tpu.vector_store %arg6[%c0_3, %c0_4], %3 {strides = array<i32>} : memref<32x16xf32, #tpu.memory_space<vmem>>, vector<2x16xf32>,
    %c30 = arith.constant 30 : index
    %c0_5 = arith.constant 0 : index
    %5 = vector.load %arg6[%c30, %c0_5] : memref<32x16xf32, #tpu.memory_space<vmem>>, vector<2x16xf32>
    tpu.vector_store %arg6[%c30, %c0_5], %3 {strides = array<i32>} : memref<32x16xf32, #tpu.memory_space<vmem>>, vector<2x16xf32>,
    %cst_6 = arith.constant -3.000000e+38 : f32
    %6 = vector.broadcast %cst_6 : f32 to vector<2x32xf32>
    %c0_7 = arith.constant 0 : index
    %c0_8 = arith.constant 0 : index
    %7 = vector.load %arg7[%c0_7, %c0_8] : memref<10x32xf32, #tpu.memory_space<vmem>>, vector<2x32xf32>
    tpu.vector_store %arg7[%c0_7, %c0_8], %6 {strides = array<i32>} : memref<10x32xf32, #tpu.memory_space<vmem>>, vector<2x32xf32>,
    %c8 = arith.constant 8 : index
    %c0_9 = arith.constant 0 : index
    %8 = vector.load %arg7[%c8, %c0_9] : memref<10x32xf32, #tpu.memory_space<vmem>>, vector<2x32xf32>
    tpu.vector_store %arg7[%c8, %c0_9], %6 {strides = array<i32>} : memref<10x32xf32, #tpu.memory_space<vmem>>, vector<2x32xf32>,
    %c0_10 = arith.constant 0 : index
    %c0_11 = arith.constant 0 : index
    %c0_12 = arith.constant 0 : index
    %9 = vector.load %arg1[%c0_10, %c0_11, %c0_12] : memref<2x128x1xf32, #tpu.memory_space<vmem>>, vector<1x128x1xf32>
    %10 = vector.shape_cast %9 : vector<1x128x1xf32> to vector<128x1xf32>
    %c0_13 = arith.constant 0 : index
    %c0_14 = arith.constant 0 : index
    %11 = vector.load %arg3[%c0_13, %c0_14] : memref<9x32xf32, #tpu.memory_space<vmem>>, vector<1x8xf32>
    %c1 = arith.constant 1 : index
    %c0_15 = arith.constant 0 : index
    %12 = vector.load %arg3[%c1, %c0_15] : memref<9x32xf32, #tpu.memory_space<vmem>>, vector<1x8xf32>
    %c2 = arith.constant 2 : index
    %c0_16 = arith.constant 0 : index
    %13 = vector.load %arg3[%c2, %c0_16] : memref<9x32xf32, #tpu.memory_space<vmem>>, vector<1x8xf32>
    %c0_17 = arith.constant 0 : index
    %c0_18 = arith.constant 0 : index
    %14 = vector.load %arg2[%c0_17, %c0_18] : memref<112x32xbf16, #tpu.memory_space<vmem>>, vector<5x8xbf16>
    %15 = arith.extf %14 : vector<5x8xbf16> to vector<5x8xf32>
    %cst_19 = arith.constant 0.000000e+00 : f32
    %16 = vector.broadcast %cst_19 : f32 to vector<124x8xf32>
    %17 = vector.extract_strided_slice %10 {offsets = [0, 0], sizes = [124, 1], strides = [1, 1]} : vector<128x1xf32> to vector<124x1xf32>
    %18 = vector.extract_strided_slice %15 {offsets = [0, 0], sizes = [1, 8], strides = [1, 1]} : vector<5x8xf32> to vector<1x8xf32>
    %19 = vector.broadcast %17 : vector<124x1xf32> to vector<124x8xf32>
    %20 = vector.broadcast %18 : vector<1x8xf32> to vector<124x8xf32>
    %21 = arith.mulf %19, %20 : vector<124x8xf32>
    %22 = arith.addf %16, %21 : vector<124x8xf32>
    %23 = vector.extract_strided_slice %10 {offsets = [1, 0], sizes = [124, 1], strides = [1, 1]} : vector<128x1xf32> to vector<124x1xf32>
    %24 = vector.extract_strided_slice %15 {offsets = [1, 0], sizes = [1, 8], strides = [1, 1]} : vector<5x8xf32> to vector<1x8xf32>
    %25 = vector.broadcast %23 : vector<124x1xf32> to vector<124x8xf32>
    %26 = vector.broadcast %24 : vector<1x8xf32> to vector<124x8xf32>
    %27 = arith.mulf %25, %26 : vector<124x8xf32>
    %28 = arith.addf %22, %27 : vector<124x8xf32>
    %29 = vector.extract_strided_slice %10 {offsets = [2, 0], sizes = [124, 1], strides = [1, 1]} : vector<128x1xf32> to vector<124x1xf32>
    %30 = vector.extract_strided_slice %15 {offsets = [2, 0], sizes = [1, 8], strides = [1, 1]} : vector<5x8xf32> to vector<1x8xf32>
    %31 = vector.broadcast %29 : vector<124x1xf32> to vector<124x8xf32>
    %32 = vector.broadcast %30 : vector<1x8xf32> to vector<124x8xf32>
    %33 = arith.mulf %31, %32 : vector<124x8xf32>
    %34 = arith.addf %28, %33 : vector<124x8xf32>
    %35 = vector.extract_strided_slice %10 {offsets = [3, 0], sizes = [124, 1], strides = [1, 1]} : vector<128x1xf32> to vector<124x1xf32>
    %36 = vector.extract_strided_slice %15 {offsets = [3, 0], sizes = [1, 8], strides = [1, 1]} : vector<5x8xf32> to vector<1x8xf32>
    %37 = vector.broadcast %35 : vector<124x1xf32> to vector<124x8xf32>
    %38 = vector.broadcast %36 : vector<1x8xf32> to vector<124x8xf32>
    %39 = arith.mulf %37, %38 : vector<124x8xf32>
    %40 = arith.addf %34, %39 : vector<124x8xf32>
    %41 = vector.extract_strided_slice %10 {offsets = [4, 0], sizes = [124, 1], strides = [1, 1]} : vector<128x1xf32> to vector<124x1xf32>
    %42 = vector.extract_strided_slice %15 {offsets = [4, 0], sizes = [1, 8], strides = [1, 1]} : vector<5x8xf32> to vector<1x8xf32>
    %43 = vector.broadcast %41 : vector<124x1xf32> to vector<124x8xf32>
    %44 = vector.broadcast %42 : vector<1x8xf32> to vector<124x8xf32>
    %45 = arith.mulf %43, %44 : vector<124x8xf32>
    %46 = arith.addf %40, %45 : vector<124x8xf32>
    %47 = vector.broadcast %11 : vector<1x8xf32> to vector<124x8xf32>
    %48 = arith.addf %46, %47 : vector<124x8xf32>
    %cst_20 = arith.constant 0.000000e+00 : f32
    %49 = vector.broadcast %cst_20 : f32 to vector<124x8xf32>
    %50 = arith.maximumf %48, %49 : vector<124x8xf32>
    %51 = vector.broadcast %12 : vector<1x8xf32> to vector<124x8xf32>
    %52 = arith.mulf %50, %51 : vector<124x8xf32>
    %53 = vector.broadcast %13 : vector<1x8xf32> to vector<124x8xf32>
    %54 = arith.addf %52, %53 : vector<124x8xf32>
    %c2_21 = arith.constant 2 : index
    %c0_22 = arith.constant 0 : index
    %55 = vector.load %arg5[%c2_21, %c0_22] : memref<128x8xf32, #tpu.memory_space<vmem>>, vector<124x8xf32>
    tpu.vector_store %arg5[%c2_21, %c0_22], %54 {strides = array<i32>} : memref<128x8xf32, #tpu.memory_space<vmem>>, vector<124x8xf32>,
    %c0_23 = arith.constant 0 : index
    %c0_24 = arith.constant 0 : index
    %56 = tpu.strided_load %arg5[%c0_23, %c0_24] {strides = array<i32: 4, 1>} : memref<128x8xf32, #tpu.memory_space<vmem>>, vector<32x8xf32>
    %c1_25 = arith.constant 1 : index
    %c0_26 = arith.constant 0 : index
    %57 = tpu.strided_load %arg5[%c1_25, %c0_26] {strides = array<i32: 4, 1>} : memref<128x8xf32, #tpu.memory_space<vmem>>, vector<32x8xf32>
    %58 = arith.maximumf %56, %57 : vector<32x8xf32>
    %c2_27 = arith.constant 2 : index
    %c0_28 = arith.constant 0 : index
    %59 = tpu.strided_load %arg5[%c2_27, %c0_28] {strides = array<i32: 4, 1>} : memref<128x8xf32, #tpu.memory_space<vmem>>, vector<32x8xf32>
    %60 = arith.maximumf %58, %59 : vector<32x8xf32>
    %c3 = arith.constant 3 : index
    %c0_29 = arith.constant 0 : index
    %61 = tpu.strided_load %arg5[%c3, %c0_29] {strides = array<i32: 4, 1>} : memref<128x8xf32, #tpu.memory_space<vmem>>, vector<32x8xf32>
    %62 = arith.maximumf %60, %61 : vector<32x8xf32>
    %c3_30 = arith.constant 3 : index
    %c0_31 = arith.constant 0 : index
    %63 = vector.load %arg3[%c3_30, %c0_31] : memref<9x32xf32, #tpu.memory_space<vmem>>, vector<1x16xf32>
    %c4 = arith.constant 4 : index
    %c0_32 = arith.constant 0 : index
    %64 = vector.load %arg3[%c4, %c0_32] : memref<9x32xf32, #tpu.memory_space<vmem>>, vector<1x16xf32>
    %c5 = arith.constant 5 : index
    %c0_33 = arith.constant 0 : index
    %65 = vector.load %arg3[%c5, %c0_33] : memref<9x32xf32, #tpu.memory_space<vmem>>, vector<1x16xf32>
    %66 = vector.extract_strided_slice %62 {offsets = [0, 0], sizes = [28, 8], strides = [1, 1]} : vector<32x8xf32> to vector<28x8xf32>
    %67 = vector.extract_strided_slice %62 {offsets = [1, 0], sizes = [28, 8], strides = [1, 1]} : vector<32x8xf32> to vector<28x8xf32>
    %68 = vector.extract_strided_slice %62 {offsets = [2, 0], sizes = [28, 8], strides = [1, 1]} : vector<32x8xf32> to vector<28x8xf32>
    %69 = vector.extract_strided_slice %62 {offsets = [3, 0], sizes = [28, 8], strides = [1, 1]} : vector<32x8xf32> to vector<28x8xf32>
    %70 = vector.extract_strided_slice %62 {offsets = [4, 0], sizes = [28, 8], strides = [1, 1]} : vector<32x8xf32> to vector<28x8xf32>
    %71 = tpu.concatenate %66, %67, %68, %69, %70 in 1 : vector<28x8xf32>, vector<28x8xf32>, vector<28x8xf32>, vector<28x8xf32>, vector<28x8xf32> -> vector<28x40xf32>
    %72 = arith.truncf %71 : vector<28x40xf32> to vector<28x40xbf16>
    %c16 = arith.constant 16 : index
    %c0_34 = arith.constant 0 : index
    %73 = vector.load %arg2[%c16, %c0_34] : memref<112x32xbf16, #tpu.memory_space<vmem>>, vector<40x16xbf16>
    %cst_35 = arith.constant dense<0.000000e+00> : vector<28x16xf32>
    %74 = tpu.matmul %72, %73, %cst_35 {dimension_numbers = #tpu.dot_dimension_numbers<[1], [0], [0], [1], [0, 0, 1, 1], [], []>} : vector<28x40xbf16>, vector<40x16xbf16>, vector<28x16xf32> -> vector<28x16xf32>
    %75 = vector.broadcast %63 : vector<1x16xf32> to vector<28x16xf32>
    %76 = arith.addf %74, %75 : vector<28x16xf32>
    %cst_36 = arith.constant 0.000000e+00 : f32
    %77 = vector.broadcast %cst_36 : f32 to vector<28x16xf32>
    %78 = arith.maximumf %76, %77 : vector<28x16xf32>
    %79 = vector.broadcast %64 : vector<1x16xf32> to vector<28x16xf32>
    %80 = arith.mulf %78, %79 : vector<28x16xf32>
    %81 = vector.broadcast %65 : vector<1x16xf32> to vector<28x16xf32>
    %82 = arith.addf %80, %81 : vector<28x16xf32>
    %c2_37 = arith.constant 2 : index
    %c0_38 = arith.constant 0 : index
    %83 = vector.load %arg6[%c2_37, %c0_38] : memref<32x16xf32, #tpu.memory_space<vmem>>, vector<28x16xf32>
    tpu.vector_store %arg6[%c2_37, %c0_38], %82 {strides = array<i32>} : memref<32x16xf32, #tpu.memory_space<vmem>>, vector<28x16xf32>,
    %c0_39 = arith.constant 0 : index
    %c0_40 = arith.constant 0 : index
    %84 = tpu.strided_load %arg6[%c0_39, %c0_40] {strides = array<i32: 4, 1>} : memref<32x16xf32, #tpu.memory_space<vmem>>, vector<8x16xf32>
    %c1_41 = arith.constant 1 : index
    %c0_42 = arith.constant 0 : index
    %85 = tpu.strided_load %arg6[%c1_41, %c0_42] {strides = array<i32: 4, 1>} : memref<32x16xf32, #tpu.memory_space<vmem>>, vector<8x16xf32>
    %86 = arith.maximumf %84, %85 : vector<8x16xf32>
    %c2_43 = arith.constant 2 : index
    %c0_44 = arith.constant 0 : index
    %87 = tpu.strided_load %arg6[%c2_43, %c0_44] {strides = array<i32: 4, 1>} : memref<32x16xf32, #tpu.memory_space<vmem>>, vector<8x16xf32>
    %88 = arith.maximumf %86, %87 : vector<8x16xf32>
    %c3_45 = arith.constant 3 : index
    %c0_46 = arith.constant 0 : index
    %89 = tpu.strided_load %arg6[%c3_45, %c0_46] {strides = array<i32: 4, 1>} : memref<32x16xf32, #tpu.memory_space<vmem>>, vector<8x16xf32>
    %90 = arith.maximumf %88, %89 : vector<8x16xf32>
    %c6 = arith.constant 6 : index
    %c0_47 = arith.constant 0 : index
    %91 = vector.load %arg3[%c6, %c0_47] : memref<9x32xf32, #tpu.memory_space<vmem>>, vector<1x32xf32>
    %c7 = arith.constant 7 : index
    %c0_48 = arith.constant 0 : index
    %92 = vector.load %arg3[%c7, %c0_48] : memref<9x32xf32, #tpu.memory_space<vmem>>, vector<1x32xf32>
    %c8_49 = arith.constant 8 : index
    %c0_50 = arith.constant 0 : index
    %93 = vector.load %arg3[%c8_49, %c0_50] : memref<9x32xf32, #tpu.memory_space<vmem>>, vector<1x32xf32>
    %94 = vector.extract_strided_slice %90 {offsets = [0, 0], sizes = [6, 16], strides = [1, 1]} : vector<8x16xf32> to vector<6x16xf32>
    %95 = vector.extract_strided_slice %90 {offsets = [1, 0], sizes = [6, 16], strides = [1, 1]} : vector<8x16xf32> to vector<6x16xf32>
    %96 = vector.extract_strided_slice %90 {offsets = [2, 0], sizes = [6, 16], strides = [1, 1]} : vector<8x16xf32> to vector<6x16xf32>
    %97 = tpu.concatenate %94, %95, %96 in 1 : vector<6x16xf32>, vector<6x16xf32>, vector<6x16xf32> -> vector<6x48xf32>
    %98 = arith.truncf %97 : vector<6x48xf32> to vector<6x48xbf16>
    %c64 = arith.constant 64 : index
    %c0_51 = arith.constant 0 : index
    %99 = vector.load %arg2[%c64, %c0_51] : memref<112x32xbf16, #tpu.memory_space<vmem>>, vector<48x32xbf16>
    %cst_52 = arith.constant dense<0.000000e+00> : vector<6x32xf32>
    %100 = tpu.matmul %98, %99, %cst_52 {dimension_numbers = #tpu.dot_dimension_numbers<[1], [0], [0], [1], [0, 0, 1, 1], [], []>} : vector<6x48xbf16>, vector<48x32xbf16>, vector<6x32xf32> -> vector<6x32xf32>
    %101 = vector.broadcast %91 : vector<1x32xf32> to vector<6x32xf32>
    %102 = arith.addf %100, %101 : vector<6x32xf32>
    %cst_53 = arith.constant 0.000000e+00 : f32
    %103 = vector.broadcast %cst_53 : f32 to vector<6x32xf32>
    %104 = arith.maximumf %102, %103 : vector<6x32xf32>
    %105 = vector.broadcast %92 : vector<1x32xf32> to vector<6x32xf32>
    %106 = arith.mulf %104, %105 : vector<6x32xf32>
    %107 = vector.broadcast %93 : vector<1x32xf32> to vector<6x32xf32>
    %108 = arith.addf %106, %107 : vector<6x32xf32>
    %c2_54 = arith.constant 2 : index
    %c0_55 = arith.constant 0 : index
    %109 = vector.load %arg7[%c2_54, %c0_55] : memref<10x32xf32, #tpu.memory_space<vmem>>, vector<6x32xf32>
    tpu.vector_store %arg7[%c2_54, %c0_55], %108 {strides = array<i32>} : memref<10x32xf32, #tpu.memory_space<vmem>>, vector<6x32xf32>,
    %c0_56 = arith.constant 0 : index
    %c0_57 = arith.constant 0 : index
    %110 = tpu.strided_load %arg7[%c0_56, %c0_57] {strides = array<i32: 4, 1>} : memref<10x32xf32, #tpu.memory_space<vmem>>, vector<2x32xf32>
    %c1_58 = arith.constant 1 : index
    %c0_59 = arith.constant 0 : index
    %111 = tpu.strided_load %arg7[%c1_58, %c0_59] {strides = array<i32: 4, 1>} : memref<10x32xf32, #tpu.memory_space<vmem>>, vector<2x32xf32>
    %112 = arith.maximumf %110, %111 : vector<2x32xf32>
    %c2_60 = arith.constant 2 : index
    %c0_61 = arith.constant 0 : index
    %113 = tpu.strided_load %arg7[%c2_60, %c0_61] {strides = array<i32: 4, 1>} : memref<10x32xf32, #tpu.memory_space<vmem>>, vector<2x32xf32>
    %114 = arith.maximumf %112, %113 : vector<2x32xf32>
    %c3_62 = arith.constant 3 : index
    %c0_63 = arith.constant 0 : index
    %115 = tpu.strided_load %arg7[%c3_62, %c0_63] {strides = array<i32: 4, 1>} : memref<10x32xf32, #tpu.memory_space<vmem>>, vector<2x32xf32>
    %116 = arith.maximumf %114, %115 : vector<2x32xf32>
    %c0_64 = arith.constant 0 : index
    %c0_65 = arith.constant 0 : index
    %c0_66 = arith.constant 0 : index
    %117 = vector.load %arg4[%c0_64, %c0_65, %c0_66] : memref<2x2x32xf32, #tpu.memory_space<vmem>>, vector<1x2x32xf32>
    %118 = vector.shape_cast %117 : vector<1x2x32xf32> to vector<2x32xf32>
    %119 = vector.shape_cast %116 : vector<2x32xf32> to vector<1x2x32xf32>
    tpu.vector_store %arg4[%c0_64, %c0_65, %c0_66], %119 {strides = array<i32>} : memref<2x2x32xf32, #tpu.memory_space<vmem>>, vector<1x2x32xf32>,
    %c1_67 = arith.constant 1 : index
    %c0_68 = arith.constant 0 : index
    %c0_69 = arith.constant 0 : index
    %120 = vector.load %arg1[%c1_67, %c0_68, %c0_69] : memref<2x128x1xf32, #tpu.memory_space<vmem>>, vector<1x128x1xf32>
    %121 = vector.shape_cast %120 : vector<1x128x1xf32> to vector<128x1xf32>
    %c0_70 = arith.constant 0 : index
    %c0_71 = arith.constant 0 : index
    %122 = vector.load %arg3[%c0_70, %c0_71] : memref<9x32xf32, #tpu.memory_space<vmem>>, vector<1x8xf32>
    %c1_72 = arith.constant 1 : index
    %c0_73 = arith.constant 0 : index
    %123 = vector.load %arg3[%c1_72, %c0_73] : memref<9x32xf32, #tpu.memory_space<vmem>>, vector<1x8xf32>
    %c2_74 = arith.constant 2 : index
    %c0_75 = arith.constant 0 : index
    %124 = vector.load %arg3[%c2_74, %c0_75] : memref<9x32xf32, #tpu.memory_space<vmem>>, vector<1x8xf32>
    %c0_76 = arith.constant 0 : index
    %c0_77 = arith.constant 0 : index
    %125 = vector.load %arg2[%c0_76, %c0_77] : memref<112x32xbf16, #tpu.memory_space<vmem>>, vector<5x8xbf16>
    %126 = arith.extf %125 : vector<5x8xbf16> to vector<5x8xf32>
    %cst_78 = arith.constant 0.000000e+00 : f32
    %127 = vector.broadcast %cst_78 : f32 to vector<124x8xf32>
    %128 = vector.extract_strided_slice %121 {offsets = [0, 0], sizes = [124, 1], strides = [1, 1]} : vector<128x1xf32> to vector<124x1xf32>
    %129 = vector.extract_strided_slice %126 {offsets = [0, 0], sizes = [1, 8], strides = [1, 1]} : vector<5x8xf32> to vector<1x8xf32>
    %130 = vector.broadcast %128 : vector<124x1xf32> to vector<124x8xf32>
    %131 = vector.broadcast %129 : vector<1x8xf32> to vector<124x8xf32>
    %132 = arith.mulf %130, %131 : vector<124x8xf32>
    %133 = arith.addf %127, %132 : vector<124x8xf32>
    %134 = vector.extract_strided_slice %121 {offsets = [1, 0], sizes = [124, 1], strides = [1, 1]} : vector<128x1xf32> to vector<124x1xf32>
    %135 = vector.extract_strided_slice %126 {offsets = [1, 0], sizes = [1, 8], strides = [1, 1]} : vector<5x8xf32> to vector<1x8xf32>
    %136 = vector.broadcast %134 : vector<124x1xf32> to vector<124x8xf32>
    %137 = vector.broadcast %135 : vector<1x8xf32> to vector<124x8xf32>
    %138 = arith.mulf %136, %137 : vector<124x8xf32>
    %139 = arith.addf %133, %138 : vector<124x8xf32>
    %140 = vector.extract_strided_slice %121 {offsets = [2, 0], sizes = [124, 1], strides = [1, 1]} : vector<128x1xf32> to vector<124x1xf32>
    %141 = vector.extract_strided_slice %126 {offsets = [2, 0], sizes = [1, 8], strides = [1, 1]} : vector<5x8xf32> to vector<1x8xf32>
    %142 = vector.broadcast %140 : vector<124x1xf32> to vector<124x8xf32>
    %143 = vector.broadcast %141 : vector<1x8xf32> to vector<124x8xf32>
    %144 = arith.mulf %142, %143 : vector<124x8xf32>
    %145 = arith.addf %139, %144 : vector<124x8xf32>
    %146 = vector.extract_strided_slice %121 {offsets = [3, 0], sizes = [124, 1], strides = [1, 1]} : vector<128x1xf32> to vector<124x1xf32>
    %147 = vector.extract_strided_slice %126 {offsets = [3, 0], sizes = [1, 8], strides = [1, 1]} : vector<5x8xf32> to vector<1x8xf32>
    %148 = vector.broadcast %146 : vector<124x1xf32> to vector<124x8xf32>
    %149 = vector.broadcast %147 : vector<1x8xf32> to vector<124x8xf32>
    %150 = arith.mulf %148, %149 : vector<124x8xf32>
    %151 = arith.addf %145, %150 : vector<124x8xf32>
    %152 = vector.extract_strided_slice %121 {offsets = [4, 0], sizes = [124, 1], strides = [1, 1]} : vector<128x1xf32> to vector<124x1xf32>
    %153 = vector.extract_strided_slice %126 {offsets = [4, 0], sizes = [1, 8], strides = [1, 1]} : vector<5x8xf32> to vector<1x8xf32>
    %154 = vector.broadcast %152 : vector<124x1xf32> to vector<124x8xf32>
    %155 = vector.broadcast %153 : vector<1x8xf32> to vector<124x8xf32>
    %156 = arith.mulf %154, %155 : vector<124x8xf32>
    %157 = arith.addf %151, %156 : vector<124x8xf32>
    %158 = vector.broadcast %122 : vector<1x8xf32> to vector<124x8xf32>
    %159 = arith.addf %157, %158 : vector<124x8xf32>
    %cst_79 = arith.constant 0.000000e+00 : f32
    %160 = vector.broadcast %cst_79 : f32 to vector<124x8xf32>
    %161 = arith.maximumf %159, %160 : vector<124x8xf32>
    %162 = vector.broadcast %123 : vector<1x8xf32> to vector<124x8xf32>
    %163 = arith.mulf %161, %162 : vector<124x8xf32>
    %164 = vector.broadcast %124 : vector<1x8xf32> to vector<124x8xf32>
    %165 = arith.addf %163, %164 : vector<124x8xf32>
    %c2_80 = arith.constant 2 : index
    %c0_81 = arith.constant 0 : index
    %166 = vector.load %arg5[%c2_80, %c0_81] : memref<128x8xf32, #tpu.memory_space<vmem>>, vector<124x8xf32>
    tpu.vector_store %arg5[%c2_80, %c0_81], %165 {strides = array<i32>} : memref<128x8xf32, #tpu.memory_space<vmem>>, vector<124x8xf32>,
    %c0_82 = arith.constant 0 : index
    %c0_83 = arith.constant 0 : index
    %167 = tpu.strided_load %arg5[%c0_82, %c0_83] {strides = array<i32: 4, 1>} : memref<128x8xf32, #tpu.memory_space<vmem>>, vector<32x8xf32>
    %c1_84 = arith.constant 1 : index
    %c0_85 = arith.constant 0 : index
    %168 = tpu.strided_load %arg5[%c1_84, %c0_85] {strides = array<i32: 4, 1>} : memref<128x8xf32, #tpu.memory_space<vmem>>, vector<32x8xf32>
    %169 = arith.maximumf %167, %168 : vector<32x8xf32>
    %c2_86 = arith.constant 2 : index
    %c0_87 = arith.constant 0 : index
    %170 = tpu.strided_load %arg5[%c2_86, %c0_87] {strides = array<i32: 4, 1>} : memref<128x8xf32, #tpu.memory_space<vmem>>, vector<32x8xf32>
    %171 = arith.maximumf %169, %170 : vector<32x8xf32>
    %c3_88 = arith.constant 3 : index
    %c0_89 = arith.constant 0 : index
    %172 = tpu.strided_load %arg5[%c3_88, %c0_89] {strides = array<i32: 4, 1>} : memref<128x8xf32, #tpu.memory_space<vmem>>, vector<32x8xf32>
    %173 = arith.maximumf %171, %172 : vector<32x8xf32>
    %c3_90 = arith.constant 3 : index
    %c0_91 = arith.constant 0 : index
    %174 = vector.load %arg3[%c3_90, %c0_91] : memref<9x32xf32, #tpu.memory_space<vmem>>, vector<1x16xf32>
    %c4_92 = arith.constant 4 : index
    %c0_93 = arith.constant 0 : index
    %175 = vector.load %arg3[%c4_92, %c0_93] : memref<9x32xf32, #tpu.memory_space<vmem>>, vector<1x16xf32>
    %c5_94 = arith.constant 5 : index
    %c0_95 = arith.constant 0 : index
    %176 = vector.load %arg3[%c5_94, %c0_95] : memref<9x32xf32, #tpu.memory_space<vmem>>, vector<1x16xf32>
    %177 = vector.extract_strided_slice %173 {offsets = [0, 0], sizes = [28, 8], strides = [1, 1]} : vector<32x8xf32> to vector<28x8xf32>
    %178 = vector.extract_strided_slice %173 {offsets = [1, 0], sizes = [28, 8], strides = [1, 1]} : vector<32x8xf32> to vector<28x8xf32>
    %179 = vector.extract_strided_slice %173 {offsets = [2, 0], sizes = [28, 8], strides = [1, 1]} : vector<32x8xf32> to vector<28x8xf32>
    %180 = vector.extract_strided_slice %173 {offsets = [3, 0], sizes = [28, 8], strides = [1, 1]} : vector<32x8xf32> to vector<28x8xf32>
    %181 = vector.extract_strided_slice %173 {offsets = [4, 0], sizes = [28, 8], strides = [1, 1]} : vector<32x8xf32> to vector<28x8xf32>
    %182 = tpu.concatenate %177, %178, %179, %180, %181 in 1 : vector<28x8xf32>, vector<28x8xf32>, vector<28x8xf32>, vector<28x8xf32>, vector<28x8xf32> -> vector<28x40xf32>
    %183 = arith.truncf %182 : vector<28x40xf32> to vector<28x40xbf16>
    %c16_96 = arith.constant 16 : index
    %c0_97 = arith.constant 0 : index
    %184 = vector.load %arg2[%c16_96, %c0_97] : memref<112x32xbf16, #tpu.memory_space<vmem>>, vector<40x16xbf16>
    %cst_98 = arith.constant dense<0.000000e+00> : vector<28x16xf32>
    %185 = tpu.matmul %183, %184, %cst_98 {dimension_numbers = #tpu.dot_dimension_numbers<[1], [0], [0], [1], [0, 0, 1, 1], [], []>} : vector<28x40xbf16>, vector<40x16xbf16>, vector<28x16xf32> -> vector<28x16xf32>
    %186 = vector.broadcast %174 : vector<1x16xf32> to vector<28x16xf32>
    %187 = arith.addf %185, %186 : vector<28x16xf32>
    %cst_99 = arith.constant 0.000000e+00 : f32
    %188 = vector.broadcast %cst_99 : f32 to vector<28x16xf32>
    %189 = arith.maximumf %187, %188 : vector<28x16xf32>
    %190 = vector.broadcast %175 : vector<1x16xf32> to vector<28x16xf32>
    %191 = arith.mulf %189, %190 : vector<28x16xf32>
    %192 = vector.broadcast %176 : vector<1x16xf32> to vector<28x16xf32>
    %193 = arith.addf %191, %192 : vector<28x16xf32>
    %c2_100 = arith.constant 2 : index
    %c0_101 = arith.constant 0 : index
    %194 = vector.load %arg6[%c2_100, %c0_101] : memref<32x16xf32, #tpu.memory_space<vmem>>, vector<28x16xf32>
    tpu.vector_store %arg6[%c2_100, %c0_101], %193 {strides = array<i32>} : memref<32x16xf32, #tpu.memory_space<vmem>>, vector<28x16xf32>,
    %c0_102 = arith.constant 0 : index
    %c0_103 = arith.constant 0 : index
    %195 = tpu.strided_load %arg6[%c0_102, %c0_103] {strides = array<i32: 4, 1>} : memref<32x16xf32, #tpu.memory_space<vmem>>, vector<8x16xf32>
    %c1_104 = arith.constant 1 : index
    %c0_105 = arith.constant 0 : index
    %196 = tpu.strided_load %arg6[%c1_104, %c0_105] {strides = array<i32: 4, 1>} : memref<32x16xf32, #tpu.memory_space<vmem>>, vector<8x16xf32>
    %197 = arith.maximumf %195, %196 : vector<8x16xf32>
    %c2_106 = arith.constant 2 : index
    %c0_107 = arith.constant 0 : index
    %198 = tpu.strided_load %arg6[%c2_106, %c0_107] {strides = array<i32: 4, 1>} : memref<32x16xf32, #tpu.memory_space<vmem>>, vector<8x16xf32>
    %199 = arith.maximumf %197, %198 : vector<8x16xf32>
    %c3_108 = arith.constant 3 : index
    %c0_109 = arith.constant 0 : index
    %200 = tpu.strided_load %arg6[%c3_108, %c0_109] {strides = array<i32: 4, 1>} : memref<32x16xf32, #tpu.memory_space<vmem>>, vector<8x16xf32>
    %201 = arith.maximumf %199, %200 : vector<8x16xf32>
    %c6_110 = arith.constant 6 : index
    %c0_111 = arith.constant 0 : index
    %202 = vector.load %arg3[%c6_110, %c0_111] : memref<9x32xf32, #tpu.memory_space<vmem>>, vector<1x32xf32>
    %c7_112 = arith.constant 7 : index
    %c0_113 = arith.constant 0 : index
    %203 = vector.load %arg3[%c7_112, %c0_113] : memref<9x32xf32, #tpu.memory_space<vmem>>, vector<1x32xf32>
    %c8_114 = arith.constant 8 : index
    %c0_115 = arith.constant 0 : index
    %204 = vector.load %arg3[%c8_114, %c0_115] : memref<9x32xf32, #tpu.memory_space<vmem>>, vector<1x32xf32>
    %205 = vector.extract_strided_slice %201 {offsets = [0, 0], sizes = [6, 16], strides = [1, 1]} : vector<8x16xf32> to vector<6x16xf32>
    %206 = vector.extract_strided_slice %201 {offsets = [1, 0], sizes = [6, 16], strides = [1, 1]} : vector<8x16xf32> to vector<6x16xf32>
    %207 = vector.extract_strided_slice %201 {offsets = [2, 0], sizes = [6, 16], strides = [1, 1]} : vector<8x16xf32> to vector<6x16xf32>
    %208 = tpu.concatenate %205, %206, %207 in 1 : vector<6x16xf32>, vector<6x16xf32>, vector<6x16xf32> -> vector<6x48xf32>
    %209 = arith.truncf %208 : vector<6x48xf32> to vector<6x48xbf16>
    %c64_116 = arith.constant 64 : index
    %c0_117 = arith.constant 0 : index
    %210 = vector.load %arg2[%c64_116, %c0_117] : memref<112x32xbf16, #tpu.memory_space<vmem>>, vector<48x32xbf16>
    %cst_118 = arith.constant dense<0.000000e+00> : vector<6x32xf32>
    %211 = tpu.matmul %209, %210, %cst_118 {dimension_numbers = #tpu.dot_dimension_numbers<[1], [0], [0], [1], [0, 0, 1, 1], [], []>} : vector<6x48xbf16>, vector<48x32xbf16>, vector<6x32xf32> -> vector<6x32xf32>
    %212 = vector.broadcast %202 : vector<1x32xf32> to vector<6x32xf32>
    %213 = arith.addf %211, %212 : vector<6x32xf32>
    %cst_119 = arith.constant 0.000000e+00 : f32
    %214 = vector.broadcast %cst_119 : f32 to vector<6x32xf32>
    %215 = arith.maximumf %213, %214 : vector<6x32xf32>
    %216 = vector.broadcast %203 : vector<1x32xf32> to vector<6x32xf32>
    %217 = arith.mulf %215, %216 : vector<6x32xf32>
    %218 = vector.broadcast %204 : vector<1x32xf32> to vector<6x32xf32>
    %219 = arith.addf %217, %218 : vector<6x32xf32>
    %c2_120 = arith.constant 2 : index
    %c0_121 = arith.constant 0 : index
    %220 = vector.load %arg7[%c2_120, %c0_121] : memref<10x32xf32, #tpu.memory_space<vmem>>, vector<6x32xf32>
    tpu.vector_store %arg7[%c2_120, %c0_121], %219 {strides = array<i32>} : memref<10x32xf32, #tpu.memory_space<vmem>>, vector<6x32xf32>,
    %c0_122 = arith.constant 0 : index
    %c0_123 = arith.constant 0 : index
    %221 = tpu.strided_load %arg7[%c0_122, %c0_123] {strides = array<i32: 4, 1>} : memref<10x32xf32, #tpu.memory_space<vmem>>, vector<2x32xf32>
    %c1_124 = arith.constant 1 : index
    %c0_125 = arith.constant 0 : index
    %222 = tpu.strided_load %arg7[%c1_124, %c0_125] {strides = array<i32: 4, 1>} : memref<10x32xf32, #tpu.memory_space<vmem>>, vector<2x32xf32>
    %223 = arith.maximumf %221, %222 : vector<2x32xf32>
    %c2_126 = arith.constant 2 : index
    %c0_127 = arith.constant 0 : index
    %224 = tpu.strided_load %arg7[%c2_126, %c0_127] {strides = array<i32: 4, 1>} : memref<10x32xf32, #tpu.memory_space<vmem>>, vector<2x32xf32>
    %225 = arith.maximumf %223, %224 : vector<2x32xf32>
    %c3_128 = arith.constant 3 : index
    %c0_129 = arith.constant 0 : index
    %226 = tpu.strided_load %arg7[%c3_128, %c0_129] {strides = array<i32: 4, 1>} : memref<10x32xf32, #tpu.memory_space<vmem>>, vector<2x32xf32>
    %227 = arith.maximumf %225, %226 : vector<2x32xf32>
    %c1_130 = arith.constant 1 : index
    %c0_131 = arith.constant 0 : index
    %c0_132 = arith.constant 0 : index
    %228 = vector.load %arg4[%c1_130, %c0_131, %c0_132] : memref<2x2x32xf32, #tpu.memory_space<vmem>>, vector<1x2x32xf32>
    %229 = vector.shape_cast %228 : vector<1x2x32xf32> to vector<2x32xf32>
    %230 = vector.shape_cast %227 : vector<2x32xf32> to vector<1x2x32xf32>
    tpu.vector_store %arg4[%c1_130, %c0_131, %c0_132], %230 {strides = array<i32>} : memref<2x2x32xf32, #tpu.memory_space<vmem>>, vector<1x2x32xf32>,
    return
  }
  func.func @transform_0(%arg0: i32) -> (i32, i32, i32) {
    %c0_i32 = arith.constant 0 : i32
    %c0_i32_0 = arith.constant 0 : i32
    %c0_i32_1 = arith.constant 0 : i32
    return %arg0, %c0_i32, %c0_i32_0 : i32, i32, i32
  }
  func.func @transform_1(%arg0: i32) -> (i32, i32) {
    %c0_i32 = arith.constant 0 : i32
    %c0_i32_0 = arith.constant 0 : i32
    %c0_i32_1 = arith.constant 0 : i32
    return %c0_i32, %c0_i32_0 : i32, i32
  }
  func.func @transform_2(%arg0: i32) -> (i32, i32) {
    %c0_i32 = arith.constant 0 : i32
    %c0_i32_0 = arith.constant 0 : i32
    %c0_i32_1 = arith.constant 0 : i32
    return %c0_i32, %c0_i32_0 : i32, i32
  }
  func.func @transform_3(%arg0: i32) -> (i32, i32, i32) {
    %c0_i32 = arith.constant 0 : i32
    %c0_i32_0 = arith.constant 0 : i32
    %c0_i32_1 = arith.constant 0 : i32
    return %arg0, %c0_i32, %c0_i32_0 : i32, i32, i32
  }
}

</mosaic_0001>

<bundles_post_ra>
// kernel: tpu_custom_call.1
= control target key start
LH: loop header
LB: loop body
LE: loop exit
PB: predicated region body
PF: predicated region fallthrough
CT: control target
= control target key end

     0   :  { %8 = vsyncpa [#allocation6], 0  ;;  %s3867_s0 = inlined_call_operand.vmem [shape: f32[4,128,1], index: 0, kind: input, shape index: {}]   ;;  %s3868_s1 = inlined_call_operand.vmem [shape: bf16[112,32], index: 1, kind: input, shape index: {}]   ;;  %s3869_s2 = inlined_call_operand.vmem [shape: f32[9,32], index: 2, kind: input, shape index: {}]   ;;  %s3870_s3 = inlined_call_operand.hbm [shape: f32[4,2,32], index: 3, kind: output, shape index: {}]  }
   0x1   :  { %10 = vsyncpa [#allocation6 + $0x1], 0  ;;  %s2610_s12 = smov 0   ;;  %s2612_s13 = smov 0  }
   0x2   :  { %s2614_s14 = smov 0   ;;  %s2616_s15 = smov 0  }
   0x3 LB: > { %s2631_s16 = sadd.s32 4294967295, %s2578_s15   ;;  %s2243_s17 = sadd.s32 4294967294, %s2578_s15   ;;  %s2578_s15 = sphi %s2616_s15, %s3876_s15   ;;  %s2574_s14 = sphi %s2614_s14, %s3875_s14   ;;  %s2570_s13 = sphi %s2612_s13, %s3874_s13   ;;  %s2566_s12 = sphi %s2610_s12, %s3873_s12  }
   0x4   : > { %s2635_s18 = sadd.s32 1, %s2578_s15   ;;  %s91_s19 = sadd.s32 1, %s2574_s14 }
   0x5   : > { %s88_s20 = ssub.s32 %s2578_s15, %s2635_s18  ;;  %p101_p0 = scmp.ne.s32.totalorder %s2574_s14, %s2570_s13 }
   0x6   : > { %p89_p1 = scmp.eq.s32.totalorder %s88_s20, 0  ;;  %p102_p2 = scmp.eq.s32.totalorder %s2631_s16, 1 }
   0x7   : > { %p107_p3 = scmp.ne.s32.totalorder %s2570_s13, %s2566_s12  ;;  %p108_p4 = scmp.eq.s32.totalorder %s2243_s17, 1 }
   0x8   : > { %s2646_s21 = scalar_select %p89_p1, %s2574_s14, %s91_s19  }
   0x9   : > { %p2648_p5 = por %p102_p2, %p101_p0  ;;  %p2652_p6 = por %p108_p4, %p107_p3 }
   0xa   : > { %p2246_p7 = scmp.ge.s32.totalorder %s2578_s15, 1  ;;  %p142_p8 = scmp.lt.s32.totalorder %s2578_s15, 3 }
   0xc   : > { %p143_p9 = pnand %p2246_p7, %p142_p8 }
   0xd   : > { %s2248_s24 = sshll.u32 (!%p143_p9), %s2631_s16, 1  ;;  %v2580_v0 = vmov (!%p143_p9), 0   ;;  %v286_v33 = vlaneseq (!%p143_p9)  ;;  %v204_v34 = vld [vmem:[%s3868_s1] sm:$0x7] (!%p143_p9)  ;;  %vm358_vm0 = vcmask (!%p143_p9), 1046528   ;;  %vm458_vm1 = vcmask (!%p143_p9), 1045504  }
   0xe   : > { %146 = sbr.rel (%p143_p9) target bundleno = 1087 (0x43f), region = 32  ;;  %2420 = vset.pattern.permute.xlu1 (!%p143_p9), %v2580_v0  ;;  %2419 = vset.pattern.permute.xlu0 (!%p143_p9), %v2580_v0  ;;  %p168_p10 = scmp.lt.s32.totalorder (!%p143_p9), %s2248_s24, 3  ;;  %v205_v36 = vunpack.c.l.bf16 (!%p143_p9), %v204_v34  ;;  %v1212_v37 = vld [vmem:[%s3868_s1] sm:$0x7] (!%p143_p9)  ;;  %vm558_vm2 = vcmask (!%p143_p9), 1044480   ;;  %vm658_vm3 = vcmask (!%p143_p9), 1043456  }
   0xf   : > { %v287_v35 = vshrl.u32 (!%p143_p9), %v286_v33, 7  ;;  %v1213_v43 = vunpack.c.l.bf16 (!%p143_p9), %v1212_v37  ;;  %vm176_vm4 = vcmask (!%p143_p9), 58368   ;;  %v2581_v60 = vmov (!%p143_p9), -3e+38   ;;  %s2582_s4 = smov (!%p143_p9), 8   ;;  %s2583_s5 = smov (!%p143_p9), 16  }
  0x10   : > { %177 = vst.msk [vmem:[#allocation2] sm:$0x3] (!%p143_p9), %vm176_vm4, %v2581_v60  ;;  %178 = vst.msk [vmem:[#allocation2 + $0x7e] sm:$0x3] (!%p143_p9), %vm176_vm4, %v2581_v60  ;;  %vm798_vm5 = vcmask (!%p143_p9), 64512   ;;  %vm814_vm6 = vcmask (!%p143_p9), 60416  }
  0x11   : > { %v288_v38 = vsub.s32 (!%p143_p9), 0, %v287_v35  ;;  %v324_v39 = vsub.s32 (!%p143_p9), 1, %v287_v35  ;;  %v424_v40 = vsub.s32 (!%p143_p9), 2, %v287_v35  ;;  %v524_v41 = vsub.s32 (!%p143_p9), 3, %v287_v35  ;;  %s2584_s8 = smov (!%p143_p9), 24   ;;  %s2585_s9 = smov (!%p143_p9), 32  }
  0x12   : > { %v624_v42 = vsub.s32 (!%p143_p9), 4, %v287_v35  ;;  %vm946_vm7 = vcmask (!%p143_p9), 130048   ;;  %vm951_vm8 = vcmask (!%p143_p9), 195584   ;;  %vm956_vm9 = vcmask (!%p143_p9), 261120   ;;  %s164_s6 = sand.u32 (!%p143_p9), 1, %s2570_s13   ;;  %s2310_s10 = sshll.u32 (!%p143_p9), %s2631_s16, 6 }
  0x13   : > { %v2702_v44 = vrot.slane (!%p143_p9), %v205_v36, %v288_v38  ;;  %v2704_v45 = vrot.slane (!%p143_p9), %v205_v36, %v324_v39  ;;  %v2706_v46 = vrot.slane (!%p143_p9), %v205_v36, %v424_v40  ;;  %v2708_v47 = vrot.slane (!%p143_p9), %v205_v36, %v524_v41  ;;  %s2247_s7 = sshll.u32 (!%p143_p9), %s164_s6, 2  ;;  %s3817_s20 = scalar_lea.hbm (!%p143_p9), %s3870_s3, %s2310_s10 }
  0x14   : > { %v2710_v48 = vrot.slane (!%p143_p9), %v205_v36, %v624_v42  ;;  %v2712_v49 = vrot.slane (!%p143_p9), %v1213_v43, %v288_v38  ;;  %v2714_v50 = vrot.slane (!%p143_p9), %v1213_v43, %v324_v39  ;;  %v2716_v51 = vrot.slane (!%p143_p9), %v1213_v43, %v424_v40 }
  0x15   : > { %s3878_s24 = smov (!%p168_p10, %s2248_s24), 3  ;;  %v2718_v54 = vrot.slane %v1213_v43, %v524_v41  ;;  %v2720_v55 = vrot.slane %v1213_v43, %v624_v42  ;;  %vm987_vm10 = vcmask 326656   ;;  %vm179_vm11 = vcmask 123904  }
  0x16   : > { %s2309_s25 = sshll.u32 %s3878_s24, 7  ;;  %180 = vst.msk [vmem:[#allocation3] sm:$0x3] %vm179_vm11, %v2581_v60  ;;  %181 = vst.msk [vmem:[#allocation3 + $0x1e] sm:$0x3] %vm179_vm11, %v2581_v60  ;;  %vm1069_vm12 = vcmask 125952  }
  0x17   : > { %s2662_s28 = scalar_lea.vmem %s3867_s0, %s2309_s25  ;;  %vm2587_vm13 = vmmov 0   ;;  %vm1124_vm14 = vcmask 392192   ;;  %vm182_vm15 = vcmask 254976   ;;  %s3824_s24 = scalar_lea.sflag [#allocation6], %s164_s6 }
  0x18   : > { %v187_v1 = vld [vmem:[%s2662_s28 + $0x10] sm:$0xff]  ;;  %v185_v2 = vld [vmem:[%s2662_s28] sm:$0xff]  ;;  %v188_v3 = vld [vmem:[%s2662_s28 + $0x18] sm:$0xff]  ;;  %183 = vst.msk [vmem:[#allocation4] sm:$0x3] %vm182_vm15, %v2581_v60 }
  0x19   : > { %218 = vperm.xlu1 %2420, %v187_v1   ;;  %208 = vperm.xlu0 %2419, %v185_v2   ;;  %v186_v4 = vld [vmem:[%s2662_s28 + $0x8] sm:$0xff]  ;;  %v189_v6 = vld [vmem:[%s2662_s28 + $0x20] sm:$0xff]  ;;  %v192_v7 = vld [vmem:[%s2662_s28 + $0x38] sm:$0xff] }
  0x1a   : > { %v190_v5 = vld [vmem:[%s2662_s28 + $0x28] sm:$0xff]  ;;  %v191_v8 = vld [vmem:[%s2662_s28 + $0x30] sm:$0xff]  ;;  %v193_v10 = vld [vmem:[%s2662_s28 + $0x40] sm:$0xff] }
  0x1b   : > { %v194_v9 = vld [vmem:[%s2662_s28 + $0x48] sm:$0xff]  ;;  %v196_v11 = vld [vmem:[%s2662_s28 + $0x58] sm:$0xff]  ;;  %v195_v12 = vld [vmem:[%s2662_s28 + $0x50] sm:$0xff] }
  0x1c   : > { %v198_v13 = vld [vmem:[%s2662_s28 + $0x68] sm:$0xff]  ;;  %v197_v14 = vld [vmem:[%s2662_s28 + $0x60] sm:$0xff]  ;;  %v200_v15 = vld [vmem:[%s2662_s28 + $0x78] sm:$0xff] }
  0x1d   : > { %223 = vperm.xlu1 %2420, %v188_v3   ;;  %213 = vperm.xlu0 %2419, %v186_v4   ;;  %v199_v16 = vld [vmem:[%s2662_s28 + $0x70] sm:$0xff]  ;;  %v2270_v17 = vld [vmem:[%s2662_s28 + $0x88] sm:$0xff]  ;;  %v2269_v18 = vld [vmem:[%s2662_s28 + $0x80] sm:$0xff] }
  0x1e   : > { %v2272_v19 = vld [vmem:[%s2662_s28 + $0x98] sm:$0xff]  ;;  %v2271_v20 = vld [vmem:[%s2662_s28 + $0x90] sm:$0xff]  ;;  %v2274_v21 = vld [vmem:[%s2662_s28 + $0xa8] sm:$0xff] }
  0x1f   : > { %v2273_v22 = vld [vmem:[%s2662_s28 + $0xa0] sm:$0xff]  ;;  %v2276_v23 = vld [vmem:[%s2662_s28 + $0xb8] sm:$0xff]  ;;  %v2275_v24 = vld [vmem:[%s2662_s28 + $0xb0] sm:$0xff] }
  0x20   : > { %v2278_v25 = vld [vmem:[%s2662_s28 + $0xc8] sm:$0xff]  ;;  %v2277_v26 = vld [vmem:[%s2662_s28 + $0xc0] sm:$0xff]  ;;  %v2280_v27 = vld [vmem:[%s2662_s28 + $0xd8] sm:$0xff] }
  0x21   : > { %233 = vperm.xlu1 %2420, %v190_v5   ;;  %228 = vperm.xlu0 %2419, %v189_v6   ;;  %v2279_v28 = vld [vmem:[%s2662_s28 + $0xd0] sm:$0xff]  ;;  %v2282_v29 = vld [vmem:[%s2662_s28 + $0xe8] sm:$0xff]  ;;  %v2281_v30 = vld [vmem:[%s2662_s28 + $0xe0] sm:$0xff] }
  0x22   : > { %v2284_v31 = vld [vmem:[%s2662_s28 + $0xf8] sm:$0xff]  ;;  %v2283_v32 = vld [vmem:[%s2662_s28 + $0xf0] sm:$0xff] }
  0x25   : > { %243 = vperm.xlu1 %2420, %v192_v7   ;;  %238 = vperm.xlu0 %2419, %v191_v8  }
  0x29   : > { %253 = vperm.xlu1 %2420, %v194_v9   ;;  %248 = vperm.xlu0 %2419, %v193_v10  }
  0x2d   : > { %263 = vperm.xlu1 %2420, %v196_v11   ;;  %258 = vperm.xlu0 %2419, %v195_v12  }
  0x31   : > { %273 = vperm.xlu1 %2420, %v198_v13   ;;  %268 = vperm.xlu0 %2419, %v197_v14  }
  0x35   : > { %283 = vperm.xlu1 %2420, %v200_v15   ;;  %278 = vperm.xlu0 %2419, %v199_v16  }
  0x39   : > { %1221 = vperm.xlu1 %2420, %v2270_v17   ;;  %1216 = vperm.xlu0 %2419, %v2269_v18  }
  0x3d   : > { %1231 = vperm.xlu1 %2420, %v2272_v19   ;;  %1226 = vperm.xlu0 %2419, %v2271_v20  }
  0x41   : > { %1241 = vperm.xlu1 %2420, %v2274_v21   ;;  %1236 = vperm.xlu0 %2419, %v2273_v22  }
  0x45   : > { %1251 = vperm.xlu1 %2420, %v2276_v23   ;;  %1246 = vperm.xlu0 %2419, %v2275_v24  }
  0x49   : > { %1261 = vperm.xlu1 %2420, %v2278_v25   ;;  %1256 = vperm.xlu0 %2419, %v2277_v26  }
  0x4d   : > { %1271 = vperm.xlu1 %2420, %v2280_v27   ;;  %1266 = vperm.xlu0 %2419, %v2279_v28  }
  0x51   : > { %1281 = vperm.xlu1 %2420, %v2282_v29   ;;  %1276 = vperm.xlu0 %2419, %v2281_v30  }
  0x55   : > { %1291 = vperm.xlu1 %2420, %v2284_v31   ;;  %1286 = vperm.xlu0 %2419, %v2283_v32  }
  0x98   : > { %v219_v52 = vpop.permute.xlu1 %218  ;;  %v209_v53 = vpop.permute.xlu0 %208 }
  0x99   : > { %v292_v56 = vmul.f32 %v2702_v44, %v219_v52  ;;  %v328_v57 = vmul.f32 %v2704_v45, %v219_v52  ;;  %v428_v58 = vmul.f32 %v2706_v46, %v219_v52  ;;  %v528_v59 = vmul.f32 %v2708_v47, %v219_v52 }
  0x9a   : > { %v628_v61 = vmul.f32 %v2710_v48, %v219_v52  ;;  %v290_v62 = vmul.f32 %v2702_v44, %v209_v53  ;;  %v326_v63 = vmul.f32 %v2704_v45, %v209_v53  ;;  %v426_v0 = vmul.f32 %v2706_v46, %v209_v53 }
  0x9b   : > { %v362_v1 = vrot.slane %v328_v57, 1  ;;  %v462_v2 = vrot.slane %v428_v58, 2  ;;  %v562_v3 = vrot.slane %v528_v59, 3  ;;  %v526_v4 = vmul.f32 %v2708_v47, %v209_v53 }
  0x9c   : > { %v662_v5 = vrot.slane %v628_v61, 4  ;;  %v359_v6 = vrot.slane %v326_v63, 1  ;;  %v459_v7 = vrot.slane %v426_v0, 2  ;;  %v626_v8 = vmul.f32 %v2710_v48, %v209_v53  ;;  %v224_v9 = vpop.permute.xlu1 %223  ;;  %v214_v10 = vpop.permute.xlu0 %213 }
  0x9d   : > { %v559_v11 = vrot.slane %v526_v4, 3  ;;  %v2735_v12 = vmul.f32 %v2702_v44, %v224_v9  ;;  %v2738_v13 = vmul.f32 %v2704_v45, %v224_v9  ;;  %v2741_v14 = vmul.f32 %v2706_v46, %v224_v9 }
  0x9e   : > { %v659_v15 = vrot.slane %v626_v8, 4  ;;  %v2744_v16 = vmul.f32 %v2708_v47, %v224_v9  ;;  %v2747_v17 = vmul.f32 %v2710_v48, %v224_v9  ;;  %v291_v18 = vmul.f32 %v2702_v44, %v214_v10 }
  0x9f   : > { %v364_v19 = vrot.slane %v2738_v13, 1  ;;  %v464_v20 = vrot.slane %v2741_v14, 2  ;;  %v327_v21 = vmul.f32 %v2704_v45, %v214_v10  ;;  %v427_v22 = vmul.f32 %v2706_v46, %v214_v10 }
  0xa0   : > { %v564_v23 = vrot.slane %v2744_v16, 3  ;;  %v664_v24 = vrot.slane %v2747_v17, 4  ;;  %v527_v25 = vmul.f32 %v2708_v47, %v214_v10  ;;  %v627_v26 = vmul.f32 %v2710_v48, %v214_v10  ;;  %v234_v35 = vpop.permute.xlu1 %233  ;;  %v229_v0 = vpop.permute.xlu0 %228 }
  0xa1   : > { %v365_v27 = vsel %vm358_vm0, %v362_v1, %v364_v19  ;;  %v465_v28 = vsel %vm458_vm1, %v462_v2, %v464_v20  ;;  %v360_v29 = vrot.slane %v327_v21, 1  ;;  %v460_v30 = vrot.slane %v427_v22, 2 }
  0xa2   : > { %v408_v31 = vadd.f32 %v365_v27, %v292_v56  ;;  %v565_v32 = vsel %vm558_vm2, %v562_v3, %v564_v23  ;;  %v665_v33 = vsel %vm658_vm3, %v662_v5, %v664_v24  ;;  %v560_v34 = vrot.slane %v527_v25, 3 }
  0xa3   : > { %v361_v36 = vsel %vm358_vm0, %v359_v6, %v360_v29  ;;  %v363_v37 = vsel %vm358_vm0, %v360_v29, %v362_v1  ;;  %v461_v38 = vsel %vm458_vm1, %v459_v7, %v460_v30  ;;  %v463_v39 = vsel %vm458_vm1, %v460_v30, %v462_v2 }
  0xa4   : > { %v508_v40 = vadd.f32 %v465_v28, %v408_v31  ;;  %v406_v41 = vadd.f32 %v361_v36, %v290_v62  ;;  %v407_v42 = vadd.f32 %v363_v37, %v291_v18  ;;  %v561_v43 = vsel %vm558_vm2, %v559_v11, %v560_v34  ;;  %v2788_v62 = vld [vmem:[%s3869_s2] ss:$0 sm:$0xff] }
  0xa5   : > { %v563_v52 = vsel %vm558_vm2, %v560_v34, %v562_v3  ;;  %v660_v53 = vrot.slane %v627_v26, 4  ;;  %v2777_v56 = vmul.f32 %v2702_v44, %v234_v35  ;;  %v2780_v57 = vmul.f32 %v2704_v45, %v234_v35  ;;  %v2808_v26 = vld [vmem:[%s3869_s2 + $0x1] ss:$0 sm:$0xff] }
  0xa6   : > { %v608_v58 = vadd.f32 %v565_v32, %v508_v40  ;;  %v506_v59 = vadd.f32 %v461_v38, %v406_v41  ;;  %v507_v61 = vadd.f32 %v463_v39, %v407_v42  ;;  %v2783_v63 = vmul.f32 %v2706_v46, %v234_v35 }
  0xa7   : > { %v661_v1 = vsel %vm658_vm3, %v659_v15, %v660_v53  ;;  %v663_v2 = vsel %vm658_vm3, %v660_v53, %v662_v5  ;;  %v368_v3 = vrot.slane %v2780_v57, 1  ;;  %v2794_v4 = vmul.f32 %v2708_v47, %v234_v35 }
  0xa8   : > { %v708_v6 = vadd.f32 %v665_v33, %v608_v58  ;;  %v606_v7 = vadd.f32 %v561_v43, %v506_v59  ;;  %v607_v8 = vadd.f32 %v563_v52, %v507_v61  ;;  %v468_v9 = vrot.slane %v2783_v63, 2  ;;  %v244_v52 = vpop.permute.xlu1 %243 }
  0xa9   : > { %v568_v10 = vrot.slane %v2794_v4, 3  ;;  %v2799_v11 = vmul.f32 %v2710_v48, %v234_v35  ;;  %v294_v18 = vmul.f32 %v2702_v44, %v229_v0  ;;  %v330_v15 = vmul.f32 %v2704_v45, %v229_v0  ;;  %v2818_v35 = vld [vmem:[%s3869_s2 + $0x2] ss:$0 sm:$0xff] }
  0xaa   : > { %v728_v5 = vadd.f32 %v2788_v62, %v708_v6  ;;  %v706_v21 = vadd.f32 %v661_v1, %v606_v7  ;;  %v707_v22 = vadd.f32 %v663_v2, %v607_v8  ;;  %v430_v25 = vmul.f32 %v2706_v46, %v229_v0 }
  0xab   : > { %v668_v27 = vrot.slane %v2799_v11, 4  ;;  %v366_v28 = vrot.slane %v330_v15, 1  ;;  %v530_v29 = vmul.f32 %v2708_v47, %v229_v0  ;;  %v630_v30 = vmul.f32 %v2710_v48, %v229_v0 }
  0xac   : > { %v744_v31 = vmax.f32 %v728_v5, 0.0  ;;  %v726_v32 = vadd.f32 %v2788_v62, %v706_v21  ;;  %v727_v33 = vadd.f32 %v2788_v62, %v707_v22  ;;  %v466_v34 = vrot.slane %v430_v25, 2 }
  0xad   : > { %v367_v36 = vsel %vm358_vm0, %v364_v19, %v366_v28  ;;  %v369_v37 = vsel %vm358_vm0, %v366_v28, %v368_v3  ;;  %v566_v38 = vrot.slane %v530_v29, 3  ;;  %v666_v39 = vrot.slane %v630_v30, 4  ;;  %v254_v28 = vpop.permute.xlu1 %253 }
  0xae   : > { %v764_v40 = vmul.f32 %v2808_v26, %v744_v31  ;;  %v742_v41 = vmax.f32 %v726_v32, 0.0  ;;  %v743_v42 = vmax.f32 %v727_v33, 0.0  ;;  %v409_v43 = vadd.f32 %v367_v36, %v2735_v12 }
  0xaf   : > { %v410_v53 = vadd.f32 %v369_v37, %v294_v18  ;;  %v467_v13 = vsel %vm458_vm1, %v464_v20, %v466_v34  ;;  %v469_v19 = vsel %vm458_vm1, %v466_v34, %v468_v9  ;;  %v567_v58 = vsel %vm558_vm2, %v564_v23, %v566_v38  ;;  %v239_v23 = vpop.permute.xlu0 %238 }
  0xb0   : > { %v784_v59 = vadd.f32 %v2818_v35, %v764_v40  ;;  %v762_v61 = vmul.f32 %v2808_v26, %v742_v41  ;;  %v763_v12 = vmul.f32 %v2808_v26, %v743_v42  ;;  %v509_v0 = vadd.f32 %v467_v13, %v409_v43 }
  0xb1   : > { %v510_v1 = vadd.f32 %v469_v19, %v410_v53  ;;  %v569_v14 = vsel %vm558_vm2, %v566_v38, %v568_v10  ;;  %v667_v20 = vsel %vm658_vm3, %v664_v24, %v666_v39  ;;  %v669_v16 = vsel %vm658_vm3, %v666_v39, %v668_v27 }
  0xb2   : > { %801 = vst.msk [vmem:[#allocation2 + $0x12] sm:$0xff] %vm798_vm5, %v784_v59  ;;  %v782_v2 = vadd.f32 %v2818_v35, %v762_v61  ;;  %v783_v6 = vadd.f32 %v2818_v35, %v763_v12  ;;  %v609_v7 = vadd.f32 %v567_v58, %v509_v0  ;;  %v2853_v8 = vmul.f32 %v2702_v44, %v244_v52 }
  0xb3   : > { %v610_v18 = vadd.f32 %v569_v14, %v510_v1  ;;  %v2856_v17 = vmul.f32 %v2704_v45, %v244_v52  ;;  %v2859_v24 = vmul.f32 %v2706_v46, %v244_v52  ;;  %v2862_v15 = vmul.f32 %v2708_v47, %v244_v52 }
  0xb4   : > { %799 = vst.msk [vmem:[#allocation2 + $0x2] sm:$0xff] %vm798_vm5, %v782_v2  ;;  %800 = vst.msk [vmem:[#allocation2 + $0xa] sm:$0xff] %vm798_vm5, %v783_v6  ;;  %v709_v5 = vadd.f32 %v667_v20, %v609_v7  ;;  %v2867_v21 = vmul.f32 %v2710_v48, %v244_v52  ;;  %v296_v22 = vmul.f32 %v2702_v44, %v239_v23  ;;  %v249_v20 = vpop.permute.xlu0 %248 }
  0xb5   : > { %v332_v25 = vmul.f32 %v2704_v45, %v239_v23  ;;  %v710_v29 = vadd.f32 %v669_v16, %v610_v18  ;;  %v372_v30 = vrot.slane %v2856_v17, 1  ;;  %v472_v31 = vrot.slane %v2859_v24, 2 }
  0xb6   : > { %v572_v32 = vrot.slane %v2862_v15, 3  ;;  %v729_v33 = vadd.f32 %v2788_v62, %v709_v5  ;;  %v672_v34 = vrot.slane %v2867_v21, 4  ;;  %v432_v37 = vmul.f32 %v2706_v46, %v239_v23 }
  0xb7   : > { %v370_v36 = vrot.slane %v332_v25, 1  ;;  %v730_v38 = vadd.f32 %v2788_v62, %v710_v29  ;;  %v532_v39 = vmul.f32 %v2708_v47, %v239_v23  ;;  %v632_v40 = vmul.f32 %v2710_v48, %v239_v23  ;;  %v264_v29 = vpop.permute.xlu1 %263 }
  0xb8   : > { %v2881_v41 = vmul.f32 %v2702_v44, %v254_v28  ;;  %v745_v42 = vmax.f32 %v729_v33, 0.0  ;;  %v470_v53 = vrot.slane %v432_v37, 2  ;;  %v2915_v7 = vmul.f32 %v2706_v46, %v254_v28  ;;  %v259_v24 = vpop.permute.xlu0 %258 }
  0xb9   : > { %v371_v43 = vsel %vm358_vm0, %v368_v3, %v370_v36  ;;  %v373_v52 = vsel %vm358_vm0, %v370_v36, %v372_v30  ;;  %v746_v13 = vmax.f32 %v730_v38, 0.0  ;;  %v570_v59 = vrot.slane %v532_v39, 3 }
  0xba   : > { %v411_v19 = vadd.f32 %v371_v43, %v2777_v56  ;;  %v412_v58 = vadd.f32 %v373_v52, %v296_v22  ;;  %v765_v61 = vmul.f32 %v2808_v26, %v745_v42  ;;  %v471_v12 = vsel %vm458_vm1, %v468_v9, %v470_v53 }
  0xbb   : > { %v473_v57 = vsel %vm458_vm1, %v470_v53, %v472_v31  ;;  %v670_v0 = vrot.slane %v632_v40, 4  ;;  %v766_v3 = vmul.f32 %v2808_v26, %v746_v13  ;;  %v571_v56 = vsel %vm558_vm2, %v568_v10, %v570_v59 }
  0xbc   : > { %v511_v1 = vadd.f32 %v471_v12, %v411_v19  ;;  %v512_v14 = vadd.f32 %v473_v57, %v412_v58  ;;  %v785_v16 = vadd.f32 %v2818_v35, %v765_v61  ;;  %v573_v63 = vsel %vm558_vm2, %v570_v59, %v572_v32 }
  0xbd   : > { %v671_v9 = vsel %vm658_vm3, %v668_v27, %v670_v0  ;;  %v673_v23 = vsel %vm658_vm3, %v670_v0, %v672_v34  ;;  %v786_v2 = vadd.f32 %v2818_v35, %v766_v3  ;;  %v2911_v10 = vmul.f32 %v2704_v45, %v254_v28 }
  0xbe   : > { %v611_v4 = vadd.f32 %v571_v56, %v511_v1  ;;  %v612_v6 = vadd.f32 %v573_v63, %v512_v14  ;;  %802 = vst.msk [vmem:[#allocation2 + $0x1a] sm:$0xff] %vm798_vm5, %v785_v16  ;;  %v2918_v11 = vmul.f32 %v2708_v47, %v254_v28  ;;  %v2921_v27 = vmul.f32 %v2710_v48, %v254_v28 }
  0xbf   : > { %v298_v18 = vmul.f32 %v2702_v44, %v249_v20  ;;  %803 = vst.msk [vmem:[#allocation2 + $0x22] sm:$0xff] %vm798_vm5, %v786_v2  ;;  %v376_v22 = vrot.slane %v2911_v10, 1  ;;  %v334_v25 = vmul.f32 %v2704_v45, %v249_v20  ;;  %v476_v33 = vrot.slane %v2915_v7, 2 }
  0xc0   : > { %v711_v17 = vadd.f32 %v671_v9, %v611_v4  ;;  %v712_v5 = vadd.f32 %v673_v23, %v612_v6  ;;  %v576_v36 = vrot.slane %v2918_v11, 3  ;;  %v676_v37 = vrot.slane %v2921_v27, 4 }
  0xc1   : > { %v434_v28 = vmul.f32 %v2706_v46, %v249_v20  ;;  %v374_v40 = vrot.slane %v334_v25, 1  ;;  %v534_v42 = vmul.f32 %v2708_v47, %v249_v20  ;;  %v634_v52 = vmul.f32 %v2710_v48, %v249_v20 }
  0xc2   : > { %v731_v38 = vadd.f32 %v2788_v62, %v711_v17  ;;  %v732_v39 = vadd.f32 %v2788_v62, %v712_v5  ;;  %v2936_v53 = vmul.f32 %v2702_v44, %v264_v29  ;;  %v2939_v13 = vmul.f32 %v2704_v45, %v264_v29 }
  0xc3   : > { %v474_v43 = vrot.slane %v434_v28, 2  ;;  %v375_v59 = vsel %vm358_vm0, %v372_v30, %v374_v40  ;;  %v377_v61 = vsel %vm358_vm0, %v374_v40, %v376_v22  ;;  %v574_v30 = vrot.slane %v534_v42, 3 }
  0xc4   : > { %v747_v19 = vmax.f32 %v731_v38, 0.0  ;;  %v748_v58 = vmax.f32 %v732_v39, 0.0  ;;  %v413_v12 = vadd.f32 %v375_v59, %v2853_v8  ;;  %v414_v57 = vadd.f32 %v377_v61, %v298_v18  ;;  %v274_v39 = vpop.permute.xlu1 %273 }
  0xc5   : > { %v475_v0 = vsel %vm458_vm1, %v472_v31, %v474_v43  ;;  %v477_v3 = vsel %vm458_vm1, %v474_v43, %v476_v33  ;;  %v674_v56 = vrot.slane %v634_v52, 4  ;;  %v380_v63 = vrot.slane %v2939_v13, 1 }
  0xc6   : > { %v767_v1 = vmul.f32 %v2808_v26, %v747_v19  ;;  %v768_v14 = vmul.f32 %v2808_v26, %v748_v58  ;;  %v513_v20 = vadd.f32 %v475_v0, %v413_v12  ;;  %v514_v16 = vadd.f32 %v477_v3, %v414_v57 }
  0xc7   : > { %v2956_v8 = vmul.f32 %v2706_v46, %v264_v29  ;;  %v575_v23 = vsel %vm558_vm2, %v572_v32, %v574_v30  ;;  %v577_v2 = vsel %vm558_vm2, %v574_v30, %v576_v36  ;;  %v675_v18 = vsel %vm658_vm3, %v672_v34, %v674_v56 }
  0xc8   : > { %v787_v31 = vadd.f32 %v2818_v35, %v767_v1  ;;  %v788_v9 = vadd.f32 %v2818_v35, %v768_v14  ;;  %v613_v4 = vadd.f32 %v575_v23, %v513_v20  ;;  %v614_v6 = vadd.f32 %v577_v2, %v514_v16  ;;  %v269_v2 = vpop.permute.xlu0 %268 }
  0xc9   : > { %v677_v17 = vsel %vm658_vm3, %v674_v56, %v676_v37  ;;  %v480_v15 = vrot.slane %v2956_v8, 2  ;;  %v2976_v32 = vmul.f32 %v2708_v47, %v264_v29  ;;  %v2979_v5 = vmul.f32 %v2710_v48, %v264_v29 }
  0xca   : > { %804 = vst.msk [vmem:[#allocation2 + $0x2a] sm:$0xff] %vm798_vm5, %v787_v31  ;;  %805 = vst.msk [vmem:[#allocation2 + $0x32] sm:$0xff] %vm798_vm5, %v788_v9  ;;  %v300_v21 = vmul.f32 %v2702_v44, %v259_v24  ;;  %v713_v25 = vadd.f32 %v675_v18, %v613_v4  ;;  %v714_v34 = vadd.f32 %v677_v17, %v614_v6 }
  0xcb   : > { %v336_v28 = vmul.f32 %v2704_v45, %v259_v24  ;;  %v436_v38 = vmul.f32 %v2706_v46, %v259_v24  ;;  %v580_v40 = vrot.slane %v2976_v32, 3  ;;  %v680_v42 = vrot.slane %v2979_v5, 4 }
  0xcc   : > { %v536_v43 = vmul.f32 %v2708_v47, %v259_v24  ;;  %v636_v52 = vmul.f32 %v2710_v48, %v259_v24  ;;  %v733_v29 = vadd.f32 %v2788_v62, %v713_v25  ;;  %v734_v19 = vadd.f32 %v2788_v62, %v714_v34 }
  0xcd   : > { %v378_v58 = vrot.slane %v336_v28, 1  ;;  %v478_v59 = vrot.slane %v436_v38, 2  ;;  %v2991_v57 = vmul.f32 %v2702_v44, %v274_v39  ;;  %v2994_v0 = vmul.f32 %v2704_v45, %v274_v39  ;;  %v284_v38 = vpop.permute.xlu1 %283 }
  0xce   : > { %v578_v61 = vrot.slane %v536_v43, 3  ;;  %v678_v12 = vrot.slane %v636_v52, 4  ;;  %v749_v3 = vmax.f32 %v733_v29, 0.0  ;;  %v750_v1 = vmax.f32 %v734_v19, 0.0 }
  0xcf   : > { %v379_v14 = vsel %vm358_vm0, %v376_v22, %v378_v58  ;;  %v381_v30 = vsel %vm358_vm0, %v378_v58, %v380_v63  ;;  %v479_v16 = vsel %vm458_vm1, %v476_v33, %v478_v59  ;;  %v481_v24 = vsel %vm458_vm1, %v478_v59, %v480_v15 }
  0xd0   : > { %v415_v56 = vadd.f32 %v379_v14, %v2881_v41  ;;  %v416_v20 = vadd.f32 %v381_v30, %v300_v21  ;;  %v769_v31 = vmul.f32 %v2808_v26, %v749_v3  ;;  %v770_v10 = vmul.f32 %v2808_v26, %v750_v1 }
  0xd1   : > { %v579_v22 = vsel %vm558_vm2, %v576_v36, %v578_v61  ;;  %v581_v41 = vsel %vm558_vm2, %v578_v61, %v580_v40  ;;  %v679_v33 = vsel %vm658_vm3, %v676_v37, %v678_v12  ;;  %v681_v23 = vsel %vm658_vm3, %v678_v12, %v680_v42 }
  0xd2   : > { %v515_v9 = vadd.f32 %v479_v16, %v415_v56  ;;  %v516_v7 = vadd.f32 %v481_v24, %v416_v20  ;;  %v789_v4 = vadd.f32 %v2818_v35, %v769_v31  ;;  %v790_v11 = vadd.f32 %v2818_v35, %v770_v10 }
  0xd3   : > { %v384_v36 = vrot.slane %v2994_v0, 1  ;;  %v3027_v6 = vmul.f32 %v2706_v46, %v274_v39  ;;  %v3030_v27 = vmul.f32 %v2708_v47, %v274_v39  ;;  %v3033_v37 = vmul.f32 %v2710_v48, %v274_v39 }
  0xd4   : > { %v615_v18 = vadd.f32 %v579_v22, %v515_v9  ;;  %v616_v17 = vadd.f32 %v581_v41, %v516_v7  ;;  %806 = vst.msk [vmem:[#allocation2 + $0x3a] sm:$0xff] %vm798_vm5, %v789_v4  ;;  %807 = vst.msk [vmem:[#allocation2 + $0x42] sm:$0xff] %vm798_vm5, %v790_v11  ;;  %v302_v25 = vmul.f32 %v2702_v44, %v269_v2  ;;  %v279_v11 = vpop.permute.xlu0 %278 }
  0xd5   : > { %v484_v21 = vrot.slane %v3027_v6, 2  ;;  %v338_v34 = vmul.f32 %v2704_v45, %v269_v2  ;;  %v438_v28 = vmul.f32 %v2706_v46, %v269_v2  ;;  %v584_v29 = vrot.slane %v3030_v27, 3 }
  0xd6   : > { %v715_v43 = vadd.f32 %v679_v33, %v615_v18  ;;  %v716_v52 = vadd.f32 %v681_v23, %v616_v17  ;;  %v684_v39 = vrot.slane %v3033_v37, 4  ;;  %v538_v59 = vmul.f32 %v2708_v47, %v269_v2 }
  0xd7   : > { %v382_v19 = vrot.slane %v338_v34, 1  ;;  %v482_v58 = vrot.slane %v438_v28, 2  ;;  %v638_v61 = vmul.f32 %v2710_v48, %v269_v2  ;;  %v305_v1 = vmul.f32 %v2702_v44, %v284_v38 }
  0xd8   : > { %v735_v12 = vadd.f32 %v2788_v62, %v715_v43  ;;  %v736_v3 = vadd.f32 %v2788_v62, %v716_v52  ;;  %v341_v14 = vmul.f32 %v2704_v45, %v284_v38  ;;  %v582_v13 = vrot.slane %v538_v59, 3 }
  0xd9   : > { %v383_v30 = vsel %vm358_vm0, %v380_v63, %v382_v19  ;;  %v385_v56 = vsel %vm358_vm0, %v382_v19, %v384_v36  ;;  %v483_v20 = vsel %vm458_vm1, %v480_v15, %v482_v58  ;;  %v485_v16 = vsel %vm458_vm1, %v482_v58, %v484_v21  ;;  %v1222_v58 = vpop.permute.xlu1 %1221 }
  0xda   : > { %v751_v24 = vmax.f32 %v735_v12, 0.0  ;;  %v752_v31 = vmax.f32 %v736_v3, 0.0  ;;  %v417_v10 = vadd.f32 %v383_v30, %v2936_v53  ;;  %v418_v22 = vadd.f32 %v385_v56, %v302_v25 }
  0xdb   : > { %v682_v41 = vrot.slane %v638_v61, 4  ;;  %v388_v63 = vrot.slane %v341_v14, 1  ;;  %v441_v9 = vmul.f32 %v2706_v46, %v284_v38  ;;  %v583_v23 = vsel %vm558_vm2, %v580_v40, %v582_v13 }
  0xdc   : > { %v771_v7 = vmul.f32 %v2808_v26, %v751_v24  ;;  %v772_v8 = vmul.f32 %v2808_v26, %v752_v31  ;;  %v517_v33 = vadd.f32 %v483_v20, %v417_v10  ;;  %v518_v15 = vadd.f32 %v485_v16, %v418_v22 }
  0xdd   : > { %v585_v53 = vsel %vm558_vm2, %v582_v13, %v584_v29  ;;  %v683_v2 = vsel %vm658_vm3, %v680_v42, %v682_v41  ;;  %v685_v4 = vsel %vm658_vm3, %v682_v41, %v684_v39  ;;  %v421_v40 = vadd.f32 %v388_v63, %v305_v1 }
  0xde   : > { %v791_v18 = vadd.f32 %v2818_v35, %v771_v7  ;;  %v792_v17 = vadd.f32 %v2818_v35, %v772_v8  ;;  %v617_v32 = vadd.f32 %v583_v23, %v517_v33  ;;  %v618_v25 = vadd.f32 %v585_v53, %v518_v15 }
  0xdf   : > { %v488_v34 = vrot.slane %v441_v9, 2  ;;  %v541_v28 = vmul.f32 %v2708_v47, %v284_v38  ;;  %v641_v43 = vmul.f32 %v2710_v48, %v284_v38  ;;  %v304_v52 = vmul.f32 %v2702_v44, %v279_v11 }
  0xe0   : > { %808 = vst.msk [vmem:[#allocation2 + $0x4a] sm:$0xff] %vm798_vm5, %v791_v18  ;;  %809 = vst.msk [vmem:[#allocation2 + $0x52] sm:$0xff] %vm798_vm5, %v792_v17  ;;  %v717_v5 = vadd.f32 %v683_v2, %v617_v32  ;;  %v718_v42 = vadd.f32 %v685_v4, %v618_v25  ;;  %v340_v19 = vmul.f32 %v2704_v45, %v279_v11  ;;  %v1217_v4 = vpop.permute.xlu0 %1216 }
  0xe1   : > { %v521_v59 = vadd.f32 %v488_v34, %v421_v40  ;;  %v588_v61 = vrot.slane %v541_v28, 3  ;;  %v688_v12 = vrot.slane %v641_v43, 4  ;;  %v440_v3 = vmul.f32 %v2706_v46, %v279_v11  ;;  %v1232_v43 = vpop.permute.xlu1 %1231 }
  0xe2   : > { %v737_v1 = vadd.f32 %v2788_v62, %v717_v5  ;;  %v738_v38 = vadd.f32 %v2788_v62, %v718_v42  ;;  %v386_v14 = vrot.slane %v340_v19, 1  ;;  %v540_v30 = vmul.f32 %v2708_v47, %v279_v11 }
  0xe3   : > { %v621_v56 = vadd.f32 %v588_v61, %v521_v59  ;;  %v486_v20 = vrot.slane %v440_v3, 2  ;;  %v640_v16 = vmul.f32 %v2710_v48, %v279_v11  ;;  %v3091_v44 = vmul.f32 %v2712_v49, %v1222_v58 }
  0xe4   : > { %v753_v45 = vmax.f32 %v737_v1, 0.0  ;;  %v754_v24 = vmax.f32 %v738_v38, 0.0  ;;  %v387_v46 = vsel %vm358_vm0, %v384_v36, %v386_v14  ;;  %v389_v31 = vsel %vm358_vm0, %v386_v14, %v388_v63 }
  0xe5   : > { %v721_v10 = vadd.f32 %v688_v12, %v621_v56  ;;  %v419_v22 = vadd.f32 %v387_v46, %v2991_v57  ;;  %v420_v47 = vadd.f32 %v389_v31, %v304_v52  ;;  %v487_v48 = vsel %vm458_vm1, %v484_v21, %v486_v20 }
  0xe6   : > { %v773_v13 = vmul.f32 %v2808_v26, %v753_v45  ;;  %v774_v41 = vmul.f32 %v2808_v26, %v754_v24  ;;  %v489_v9 = vsel %vm458_vm1, %v486_v20, %v488_v34  ;;  %v586_v7 = vrot.slane %v540_v30, 3 }
  0xe7   : > { %v741_v0 = vadd.f32 %v2788_v62, %v721_v10  ;;  %v519_v36 = vadd.f32 %v487_v48, %v419_v22  ;;  %v520_v8 = vadd.f32 %v489_v9, %v420_v47  ;;  %v686_v63 = vrot.slane %v640_v16, 4  ;;  %v1227_v10 = vpop.permute.xlu0 %1226 }
  0xe8   : > { %v793_v33 = vadd.f32 %v2818_v35, %v773_v13  ;;  %v794_v57 = vadd.f32 %v2818_v35, %v774_v41  ;;  %v587_v6 = vsel %vm558_vm2, %v584_v29, %v586_v7  ;;  %v589_v21 = vsel %vm558_vm2, %v586_v7, %v588_v61 }
  0xe9   : > { %v757_v15 = vmax.f32 %v741_v0, 0.0  ;;  %v619_v23 = vadd.f32 %v587_v6, %v519_v36  ;;  %v620_v53 = vadd.f32 %v589_v21, %v520_v8  ;;  %v687_v2 = vsel %vm658_vm3, %v684_v39, %v686_v63  ;;  %v1242_v36 = vpop.permute.xlu1 %1241 }
  0xea   : > { %810 = vst.msk [vmem:[#allocation2 + $0x5a] sm:$0xff] %vm798_vm5, %v793_v33  ;;  %811 = vst.msk [vmem:[#allocation2 + $0x62] sm:$0xff] %vm798_vm5, %v794_v57  ;;  %v689_v11 = vsel %vm658_vm3, %v686_v63, %v688_v12  ;;  %v3118_v27 = vmul.f32 %v2714_v50, %v1222_v58  ;;  %v3121_v29 = vmul.f32 %v2716_v51, %v1222_v58 }
  0xeb   : > { %v3124_v18 = vmul.f32 %v2718_v54, %v1222_v58  ;;  %v777_v37 = vmul.f32 %v2808_v26, %v757_v15  ;;  %v719_v17 = vadd.f32 %v687_v2, %v619_v23  ;;  %v720_v39 = vadd.f32 %v689_v11, %v620_v53 }
  0xec   : > { %v3128_v32 = vmul.f32 %v2720_v55, %v1222_v58  ;;  %v1367_v25 = vrot.slane %v3118_v27, 1  ;;  %v1466_v40 = vrot.slane %v3121_v29, 2  ;;  %v1298_v28 = vmul.f32 %v2712_v49, %v1217_v4 }
  0xed   : > { %v1565_v34 = vrot.slane %v3124_v18, 3  ;;  %v797_v5 = vadd.f32 %v2818_v35, %v777_v37  ;;  %v739_v42 = vadd.f32 %v2788_v62, %v719_v17  ;;  %v740_v52 = vadd.f32 %v2788_v62, %v720_v39 }
  0xee   : > { %v1664_v19 = vrot.slane %v3128_v32, 4  ;;  %v1334_v58 = vmul.f32 %v2714_v50, %v1217_v4  ;;  %v1433_v59 = vmul.f32 %v2716_v51, %v1217_v4  ;;  %v1532_v61 = vmul.f32 %v2718_v54, %v1217_v4 }
  0xef   : > { %v1631_v12 = vmul.f32 %v2720_v55, %v1217_v4  ;;  %815 = vst.msk [vmem:[#allocation2 + $0x7a] sm:$0xf] %vm814_vm6, %v797_v5  ;;  %v755_v3 = vmax.f32 %v739_v42, 0.0  ;;  %v756_v1 = vmax.f32 %v740_v52, 0.0  ;;  %v3144_v38 = vmul.f32 %v2712_v49, %v1232_v43 }
  0xf0   : > { %v3147_v14 = vmul.f32 %v2714_v50, %v1232_v43  ;;  %v1366_v30 = vrot.slane %v1334_v58, 1  ;;  %v1465_v56 = vrot.slane %v1433_v59, 2  ;;  %v1564_v20 = vrot.slane %v1532_v61, 3 }
  0xf1   : > { %v1663_v16 = vrot.slane %v1631_v12, 4  ;;  %v775_v45 = vmul.f32 %v2808_v26, %v755_v3  ;;  %v776_v24 = vmul.f32 %v2808_v26, %v756_v1  ;;  %v3153_v31 = vmul.f32 %v2716_v51, %v1232_v43  ;;  %v1237_v12 = vpop.permute.xlu0 %1236 }
  0xf2   : > { %v1371_v46 = vrot.slane %v3147_v14, 1  ;;  %v1368_v22 = vsel %vm358_vm0, %v1366_v30, %v1367_v25  ;;  %v1467_v47 = vsel %vm458_vm1, %v1465_v56, %v1466_v40  ;;  %v1566_v48 = vsel %vm558_vm2, %v1564_v20, %v1565_v34 }
  0xf3   : > { %v1665_v13 = vsel %vm658_vm3, %v1663_v16, %v1664_v19  ;;  %v795_v41 = vadd.f32 %v2818_v35, %v775_v45  ;;  %v796_v9 = vadd.f32 %v2818_v35, %v776_v24  ;;  %v1413_v7 = vadd.f32 %v1368_v22, %v1298_v28 }
  0xf4   : > { %v1470_v0 = vrot.slane %v3153_v31, 2  ;;  %v3163_v8 = vmul.f32 %v2718_v54, %v1232_v43  ;;  %v3166_v63 = vmul.f32 %v2720_v55, %v1232_v43  ;;  %v1300_v33 = vmul.f32 %v2712_v49, %v1227_v10 }
  0xf5   : > { %v1336_v57 = vmul.f32 %v2714_v50, %v1227_v10  ;;  %812 = vst.msk [vmem:[#allocation2 + $0x6a] sm:$0xff] %vm798_vm5, %v795_v41  ;;  %813 = vst.msk [vmem:[#allocation2 + $0x72] sm:$0xff] %vm798_vm5, %v796_v9  ;;  %v1512_v6 = vadd.f32 %v1467_v47, %v1413_v7  ;;  %v1435_v21 = vmul.f32 %v2716_v51, %v1227_v10 }
  0xf6   : > { %v1534_v15 = vmul.f32 %v2718_v54, %v1227_v10  ;;  %v1633_v23 = vmul.f32 %v2720_v55, %v1227_v10  ;;  %v1569_v53 = vrot.slane %v3163_v8, 3  ;;  %v1668_v2 = vrot.slane %v3166_v63, 4  ;;  %v1252_v10 = vpop.permute.xlu1 %1251 }
  0xf7   : > { %v1369_v4 = vrot.slane %v1336_v57, 1  ;;  %v3178_v11 = vmul.f32 %v2712_v49, %v1242_v36  ;;  %v1611_v27 = vadd.f32 %v1566_v48, %v1512_v6  ;;  %v1468_v29 = vrot.slane %v1435_v21, 2 }
  0xf8   : > { %v1567_v18 = vrot.slane %v1534_v15, 3  ;;  %v1666_v37 = vrot.slane %v1633_v23, 4  ;;  %v3185_v32 = vmul.f32 %v2714_v50, %v1242_v36  ;;  %v3188_v28 = vmul.f32 %v2716_v51, %v1242_v36 }
  0xf9   : > { %v1370_v17 = vsel %vm358_vm0, %v1367_v25, %v1369_v4  ;;  %v1372_v39 = vsel %vm358_vm0, %v1369_v4, %v1371_v46  ;;  %v1710_v43 = vadd.f32 %v1665_v13, %v1611_v27  ;;  %v1469_v52 = vsel %vm458_vm1, %v1466_v40, %v1468_v29 }
  0xfa   : > { %v1414_v5 = vadd.f32 %v1370_v17, %v3091_v44  ;;  %v1415_v42 = vadd.f32 %v1372_v39, %v1300_v33  ;;  %v1471_v25 = vsel %vm458_vm1, %v1468_v29, %v1470_v0  ;;  %v1568_v58 = vsel %vm558_vm2, %v1565_v34, %v1567_v18  ;;  %v3226_v29 = vld [vmem:[#allocation2] ss:$4 sm:$0xff] }
  0xfb   : > { %v1570_v59 = vsel %vm558_vm2, %v1567_v18, %v1569_v53  ;;  %v1667_v61 = vsel %vm658_vm3, %v1664_v19, %v1666_v37  ;;  %v1730_v3 = vadd.f32 %v2788_v62, %v1710_v43  ;;  %v1669_v40 = vsel %vm658_vm3, %v1666_v37, %v1668_v2  ;;  %v3240_v43 = vld [vmem:[#allocation2 + $0x1] ss:$4 sm:$0xff] }
  0xfc   : > { %v1513_v1 = vadd.f32 %v1469_v52, %v1414_v5  ;;  %v1514_v44 = vadd.f32 %v1471_v25, %v1415_v42  ;;  %v1375_v30 = vrot.slane %v3185_v32, 1  ;;  %v1474_v56 = vrot.slane %v3188_v28, 2  ;;  %v3242_v5 = vld [vmem:[#allocation2 + $0x2] ss:$4 sm:$0xff]  ;;  %v3244_v42 = vld [vmem:[#allocation2 + $0x3] ss:$4 sm:$0xff] }
  0xfd   : > { %v3207_v34 = vmul.f32 %v2718_v54, %v1242_v36  ;;  %v3210_v20 = vmul.f32 %v2720_v55, %v1242_v36  ;;  %v1746_v19 = vmax.f32 %v1730_v3, 0.0  ;;  %v1302_v24 = vmul.f32 %v2712_v49, %v1237_v12 }
  0xfe   : > { %v1612_v16 = vadd.f32 %v1568_v58, %v1513_v1  ;;  %v1613_v45 = vadd.f32 %v1570_v59, %v1514_v44  ;;  %v1338_v48 = vmul.f32 %v2714_v50, %v1237_v12  ;;  %v1437_v13 = vmul.f32 %v2716_v51, %v1237_v12  ;;  %v1247_v1 = vpop.permute.xlu0 %1246 }
  0xff   : > { %v1573_v22 = vrot.slane %v3207_v34, 3  ;;  %v1672_v47 = vrot.slane %v3210_v20, 4  ;;  %v1766_v41 = vmul.f32 %v2808_v26, %v1746_v19  ;;  %v1536_v36 = vmul.f32 %v2718_v54, %v1237_v12 }
 0x100   : > { %v1711_v9 = vadd.f32 %v1667_v61, %v1612_v16  ;;  %v1712_v7 = vadd.f32 %v1669_v40, %v1613_v45  ;;  %v1373_v33 = vrot.slane %v1338_v48, 1  ;;  %v1472_v57 = vrot.slane %v1437_v13, 2 }
 0x101   : > { %v1635_v6 = vmul.f32 %v2720_v55, %v1237_v12  ;;  %v3221_v21 = vmul.f32 %v2712_v49, %v1252_v10  ;;  %v1786_v15 = vadd.f32 %v2818_v35, %v1766_v41  ;;  %v1571_v27 = vrot.slane %v1536_v36, 3 }
 0x102   : > { %v1731_v23 = vadd.f32 %v2788_v62, %v1711_v9  ;;  %v1732_v4 = vadd.f32 %v2788_v62, %v1712_v7  ;;  %v1374_v18 = vsel %vm358_vm0, %v1371_v46, %v1373_v33  ;;  %v1376_v37 = vsel %vm358_vm0, %v1373_v33, %v1375_v30  ;;  %v1262_v33 = vpop.permute.xlu1 %1261 }
 0x103   : > { %v1473_v17 = vsel %vm458_vm1, %v1470_v0, %v1472_v57  ;;  %v1475_v39 = vsel %vm458_vm1, %v1472_v57, %v1474_v56  ;;  %v1416_v52 = vadd.f32 %v1374_v18, %v3144_v38  ;;  %v1417_v25 = vadd.f32 %v1376_v37, %v1302_v24  ;;  %1802 = vst.msk [vmem:[#allocation2 + $0x2] sm:$0xff] %vm798_vm5, %v1786_v15 }
 0x104   : > { %v1747_v14 = vmax.f32 %v1731_v23, 0.0  ;;  %v1748_v46 = vmax.f32 %v1732_v4, 0.0  ;;  %v1572_v31 = vsel %vm558_vm2, %v1569_v53, %v1571_v27  ;;  %v1574_v0 = vsel %vm558_vm2, %v1571_v27, %v1573_v22 }
 0x105   : > { %v1670_v58 = vrot.slane %v1635_v6, 4  ;;  %v3255_v59 = vmul.f32 %v2714_v50, %v1252_v10  ;;  %v1515_v38 = vadd.f32 %v1473_v17, %v1416_v52  ;;  %v1516_v3 = vadd.f32 %v1475_v39, %v1417_v25 }
 0x106   : > { %v1767_v61 = vmul.f32 %v2808_v26, %v1747_v14  ;;  %v1768_v12 = vmul.f32 %v2808_v26, %v1748_v46  ;;  %v3267_v40 = vmul.f32 %v2716_v51, %v1252_v10  ;;  %v3273_v63 = vmul.f32 %v2718_v54, %v1252_v10 }
 0x107   : > { %v1671_v8 = vsel %vm658_vm3, %v1668_v2, %v1670_v58  ;;  %v1673_v53 = vsel %vm658_vm3, %v1670_v58, %v1672_v47  ;;  %v1379_v44 = vrot.slane %v3255_v59, 1  ;;  %v1614_v45 = vadd.f32 %v1572_v31, %v1515_v38 }
 0x108   : > { %v1787_v19 = vadd.f32 %v2818_v35, %v1767_v61  ;;  %v1788_v16 = vadd.f32 %v2818_v35, %v1768_v12  ;;  %v1615_v24 = vadd.f32 %v1574_v0, %v1516_v3  ;;  %v1478_v48 = vrot.slane %v3267_v40, 2 }
 0x109   : > { %v3276_v2 = vmul.f32 %v2720_v55, %v1252_v10  ;;  %v1304_v13 = vmul.f32 %v2712_v49, %v1247_v1  ;;  %v1713_v41 = vadd.f32 %v1671_v8, %v1614_v45  ;;  %v1340_v7 = vmul.f32 %v2714_v50, %v1247_v1  ;;  %v1257_v8 = vpop.permute.xlu0 %1256 }
 0x10a   : > { %v1714_v9 = vadd.f32 %v1673_v53, %v1615_v24  ;;  %v1439_v36 = vmul.f32 %v2716_v51, %v1247_v1  ;;  %1803 = vst.msk [vmem:[#allocation2 + $0xa] sm:$0xff] %vm798_vm5, %v1787_v19  ;;  %1804 = vst.msk [vmem:[#allocation2 + $0x12] sm:$0xff] %vm798_vm5, %v1788_v16  ;;  %v1577_v57 = vrot.slane %v3273_v63, 3  ;;  %v1538_v10 = vmul.f32 %v2718_v54, %v1247_v1  ;;  %v3328_v16 = vld [vmem:[#allocation2 + $0x20] ss:$4 sm:$0xff] }
 0x10b   : > { %v1676_v6 = vrot.slane %v3276_v2, 4  ;;  %v1637_v15 = vmul.f32 %v2720_v55, %v1247_v1  ;;  %v1733_v23 = vadd.f32 %v2788_v62, %v1713_v41  ;;  %v1377_v27 = vrot.slane %v1340_v7, 1  ;;  %v3338_v41 = vld [vmem:[#allocation2 + $0x22] ss:$4 sm:$0xff] }
 0x10c   : > { %v1734_v4 = vadd.f32 %v2788_v62, %v1714_v9  ;;  %v1476_v18 = vrot.slane %v1439_v36, 2  ;;  %v1575_v37 = vrot.slane %v1538_v10, 3  ;;  %v3290_v39 = vmul.f32 %v2712_v49, %v1262_v33  ;;  %v3340_v9 = vld [vmem:[#allocation2 + $0x23] ss:$4 sm:$0xff] }
 0x10d   : > { %v1674_v17 = vrot.slane %v1637_v15, 4  ;;  %v3293_v14 = vmul.f32 %v2714_v50, %v1262_v33  ;;  %v1749_v46 = vmax.f32 %v1733_v23, 0.0  ;;  %v1378_v25 = vsel %vm358_vm0, %v1375_v30, %v1377_v27  ;;  %v1272_v23 = vpop.permute.xlu1 %1271 }
 0x10e   : > { %v1750_v52 = vmax.f32 %v1734_v4, 0.0  ;;  %v1380_v31 = vsel %vm358_vm0, %v1377_v27, %v1379_v44  ;;  %v1418_v0 = vadd.f32 %v1378_v25, %v3178_v11  ;;  %v1477_v61 = vsel %vm458_vm1, %v1474_v56, %v1476_v18 }
 0x10f   : > { %v1419_v58 = vadd.f32 %v1380_v31, %v1304_v13  ;;  %v1479_v12 = vsel %vm458_vm1, %v1476_v18, %v1478_v48  ;;  %v1769_v38 = vmul.f32 %v2808_v26, %v1749_v46  ;;  %v1576_v30 = vsel %vm558_vm2, %v1573_v22, %v1575_v37  ;;  %v3336_v13 = vld [vmem:[#allocation2 + $0x21] ss:$4 sm:$0xff] }
 0x110   : > { %v1770_v32 = vmul.f32 %v2808_v26, %v1750_v52  ;;  %v1578_v11 = vsel %vm558_vm2, %v1575_v37, %v1577_v57  ;;  %v1517_v3 = vadd.f32 %v1477_v61, %v1418_v0  ;;  %v1675_v56 = vsel %vm658_vm3, %v1672_v47, %v1674_v17 }
 0x111   : > { %v1518_v28 = vadd.f32 %v1479_v12, %v1419_v58  ;;  %v1677_v1 = vsel %vm658_vm3, %v1674_v17, %v1676_v6  ;;  %v1789_v53 = vadd.f32 %v2818_v35, %v1769_v38  ;;  %v1383_v22 = vrot.slane %v3293_v14, 1  ;;  %v3438_v14 = vld [vmem:[%s3869_s2 + $0x1] ss:$0 sm:$0xff] }
 0x112   : > { %v1790_v34 = vadd.f32 %v2818_v35, %v1770_v32  ;;  %v3326_v19 = vmul.f32 %v2716_v51, %v1262_v33  ;;  %v1616_v45 = vadd.f32 %v1576_v30, %v1517_v3  ;;  %v3331_v47 = vmul.f32 %v2718_v54, %v1262_v33 }
 0x113   : > { %v1617_v20 = vadd.f32 %v1578_v11, %v1518_v28  ;;  %v3334_v24 = vmul.f32 %v2720_v55, %v1262_v33  ;;  %v1306_v36 = vmul.f32 %v2712_v49, %v1257_v8  ;;  %v1342_v10 = vmul.f32 %v2714_v50, %v1257_v8  ;;  %1805 = vst.msk [vmem:[#allocation2 + $0x1a] sm:$0xff] %vm798_vm5, %v1789_v53  ;;  %v1267_v53 = vpop.permute.xlu0 %1266 }
 0x114   : > { %v1482_v7 = vrot.slane %v3326_v19, 2  ;;  %v1441_v15 = vmul.f32 %v2716_v51, %v1257_v8  ;;  %1806 = vst.msk [vmem:[#allocation2 + $0x22] sm:$0xff] %vm798_vm5, %v1790_v34  ;;  %v1715_v33 = vadd.f32 %v1675_v56, %v1616_v45  ;;  %v1581_v27 = vrot.slane %v3331_v47, 3  ;;  %v3457_v47 = vld [vmem:[%s3869_s2 + $0x2] ss:$0 sm:$0xff] }
 0x115   : > { %v1716_v4 = vadd.f32 %v1677_v1, %v1617_v20  ;;  %v1680_v18 = vrot.slane %v3334_v24, 4  ;;  %v1381_v37 = vrot.slane %v1342_v10, 1  ;;  %v1540_v46 = vmul.f32 %v2718_v54, %v1257_v8 }
 0x116   : > { %v1480_v17 = vrot.slane %v1441_v15, 2  ;;  %v1639_v52 = vmul.f32 %v2720_v55, %v1257_v8  ;;  %v1735_v25 = vadd.f32 %v2788_v62, %v1715_v33  ;;  %v3355_v0 = vmul.f32 %v2712_v49, %v1272_v23 }
 0x117   : > { %v1736_v31 = vadd.f32 %v2788_v62, %v1716_v4  ;;  %v3358_v58 = vmul.f32 %v2714_v50, %v1272_v23  ;;  %v1382_v61 = vsel %vm358_vm0, %v1379_v44, %v1381_v37  ;;  %v1384_v12 = vsel %vm358_vm0, %v1381_v37, %v1383_v22 }
 0x118   : > { %v1481_v38 = vsel %vm458_vm1, %v1478_v48, %v1480_v17  ;;  %v1483_v62 = vsel %vm458_vm1, %v1480_v17, %v1482_v7  ;;  %v1751_v32 = vmax.f32 %v1735_v25, 0.0  ;;  %v1420_v11 = vadd.f32 %v1382_v61, %v3221_v21 }
 0x119   : > { %v1752_v30 = vmax.f32 %v1736_v31, 0.0  ;;  %v1421_v3 = vadd.f32 %v1384_v12, %v1306_v36  ;;  %v1579_v59 = vrot.slane %v1540_v46, 3  ;;  %v1678_v28 = vrot.slane %v1639_v52, 4  ;;  %v1282_v46 = vpop.permute.xlu1 %1281  ;;  %v3412_v31 = vld [vmem:[%s3869_s2] ss:$0 sm:$0xff] }
 0x11a   : > { %v1387_v44 = vrot.slane %v3358_v58, 1  ;;  %v3375_v56 = vmul.f32 %v2716_v51, %v1272_v23  ;;  %v1771_v40 = vmul.f32 %v2808_v26, %v1751_v32  ;;  %v1519_v1 = vadd.f32 %v1481_v38, %v1420_v11 }
 0x11b   : > { %v1772_v48 = vmul.f32 %v2808_v26, %v1752_v30  ;;  %v1520_v8 = vadd.f32 %v1483_v62, %v1421_v3  ;;  %v1580_v34 = vsel %vm558_vm2, %v1577_v57, %v1579_v59  ;;  %v1582_v21 = vsel %vm558_vm2, %v1579_v59, %v1581_v27 }
 0x11c   : > { %v1679_v45 = vsel %vm658_vm3, %v1676_v6, %v1678_v28  ;;  %v1681_v20 = vsel %vm658_vm3, %v1678_v28, %v1680_v18  ;;  %v1791_v26 = vadd.f32 %v2818_v35, %v1771_v40  ;;  %v1618_v10 = vadd.f32 %v1580_v34, %v1519_v1 }
 0x11d   : > { %v1792_v36 = vadd.f32 %v2818_v35, %v1772_v48  ;;  %v1619_v63 = vadd.f32 %v1582_v21, %v1520_v8  ;;  %v1486_v57 = vrot.slane %v3375_v56, 2  ;;  %v3395_v15 = vmul.f32 %v2718_v54, %v1272_v23 }
 0x11e   : > { %v3398_v33 = vmul.f32 %v2720_v55, %v1272_v23  ;;  %v1308_v2 = vmul.f32 %v2712_v49, %v1267_v53  ;;  %v1717_v6 = vadd.f32 %v1679_v45, %v1618_v10  ;;  %v1344_v37 = vmul.f32 %v2714_v50, %v1267_v53  ;;  %1807 = vst.msk [vmem:[#allocation2 + $0x2a] sm:$0xff] %vm798_vm5, %v1791_v26 }
 0x11f   : > { %v1718_v4 = vadd.f32 %v1681_v20, %v1619_v63  ;;  %v1443_v17 = vmul.f32 %v2716_v51, %v1267_v53  ;;  %1808 = vst.msk [vmem:[#allocation2 + $0x32] sm:$0xff] %vm798_vm5, %v1792_v36  ;;  %v1585_v35 = vrot.slane %v3395_v15, 3  ;;  %v1542_v23 = vmul.f32 %v2718_v54, %v1267_v53  ;;  %v1277_v36 = vpop.permute.xlu0 %1276 }
 0x120   : > { %v1684_v52 = vrot.slane %v3398_v33, 4  ;;  %v1641_v25 = vmul.f32 %v2720_v55, %v1267_v53  ;;  %v1737_v61 = vadd.f32 %v3412_v31, %v1717_v6  ;;  %v1385_v38 = vrot.slane %v1344_v37, 1 }
 0x121   : > { %v1738_v12 = vadd.f32 %v3412_v31, %v1718_v4  ;;  %v1484_v62 = vrot.slane %v1443_v17, 2  ;;  %v1583_v32 = vrot.slane %v1542_v23, 3  ;;  %v3417_v11 = vmul.f32 %v2712_v49, %v1282_v46  ;;  %v3473_v17 = vld [vmem:[#allocation2 + $0x41] ss:$4 sm:$0xff]  ;;  %v3475_v23 = vld [vmem:[#allocation2 + $0x42] ss:$4 sm:$0xff] }
 0x122   : > { %v1682_v30 = vrot.slane %v1641_v25, 4  ;;  %v3420_v3 = vmul.f32 %v2714_v50, %v1282_v46  ;;  %v1753_v59 = vmax.f32 %v1737_v61, 0.0  ;;  %v1386_v40 = vsel %vm358_vm0, %v1383_v22, %v1385_v38  ;;  %v3477_v25 = vld [vmem:[#allocation2 + $0x43] ss:$4 sm:$0xff] }
 0x123   : > { %v1754_v28 = vmax.f32 %v1738_v12, 0.0  ;;  %v1388_v48 = vsel %vm358_vm0, %v1385_v38, %v1387_v44  ;;  %v1422_v1 = vadd.f32 %v1386_v40, %v3290_v39  ;;  %v1485_v53 = vsel %vm458_vm1, %v1482_v7, %v1484_v62 }
 0x124   : > { %v1423_v8 = vadd.f32 %v1388_v48, %v1308_v2  ;;  %v1487_v34 = vsel %vm458_vm1, %v1484_v62, %v1486_v57  ;;  %v1773_v22 = vmul.f32 %v3438_v14, %v1753_v59  ;;  %v1584_v39 = vsel %vm558_vm2, %v1581_v27, %v1583_v32 }
 0x125   : > { %v1774_v21 = vmul.f32 %v3438_v14, %v1754_v28  ;;  %v1586_v19 = vsel %vm558_vm2, %v1583_v32, %v1585_v35  ;;  %v1521_v7 = vadd.f32 %v1485_v53, %v1422_v1  ;;  %v1683_v20 = vsel %vm658_vm3, %v1680_v18, %v1682_v30  ;;  %v3465_v18 = vld [vmem:[#allocation2 + $0x40] ss:$4 sm:$0xff]  ;;  %v1292_v32 = vpop.permute.xlu1 %1291 }
 0x126   : > { %v1522_v45 = vadd.f32 %v1487_v34, %v1423_v8  ;;  %v1685_v26 = vsel %vm658_vm3, %v1682_v30, %v1684_v52  ;;  %v1793_v27 = vadd.f32 %v3457_v47, %v1773_v22  ;;  %v1391_v63 = vrot.slane %v3420_v3, 1 }
 0x127   : > { %v1794_v10 = vadd.f32 %v3457_v47, %v1774_v21  ;;  %v3463_v24 = vmul.f32 %v2716_v51, %v1282_v46  ;;  %v1620_v2 = vadd.f32 %v1584_v39, %v1521_v7  ;;  %v3468_v4 = vmul.f32 %v2718_v54, %v1282_v46 }
 0x128   : > { %v1621_v6 = vadd.f32 %v1586_v19, %v1522_v45  ;;  %v3471_v37 = vmul.f32 %v2720_v55, %v1282_v46  ;;  %v1310_v12 = vmul.f32 %v2712_v49, %v1277_v36  ;;  %v1346_v38 = vmul.f32 %v2714_v50, %v1277_v36  ;;  %1809 = vst.msk [vmem:[#allocation2 + $0x3a] sm:$0xff] %vm798_vm5, %v1793_v27 }
 0x129   : > { %v1490_v61 = vrot.slane %v3463_v24, 2  ;;  %v1445_v62 = vmul.f32 %v2716_v51, %v1277_v36  ;;  %1810 = vst.msk [vmem:[#allocation2 + $0x42] sm:$0xff] %vm798_vm5, %v1794_v10  ;;  %v1719_v46 = vadd.f32 %v1683_v20, %v1620_v2  ;;  %v1589_v59 = vrot.slane %v3468_v4, 3 }
 0x12a   : > { %v1720_v30 = vadd.f32 %v1685_v26, %v1621_v6  ;;  %v1688_v28 = vrot.slane %v3471_v37, 4  ;;  %v1389_v40 = vrot.slane %v1346_v38, 1  ;;  %v1544_v1 = vmul.f32 %v2718_v54, %v1277_v36 }
 0x12b   : > { %v1488_v48 = vrot.slane %v1445_v62, 2  ;;  %v1643_v8 = vmul.f32 %v2720_v55, %v1277_v36  ;;  %v1739_v53 = vadd.f32 %v3412_v31, %v1719_v46  ;;  %v1313_v22 = vmul.f32 %v2712_v49, %v1292_v32 }
 0x12c   : > { %v1740_v34 = vadd.f32 %v3412_v31, %v1720_v30  ;;  %v1349_v21 = vmul.f32 %v2714_v50, %v1292_v32  ;;  %v1390_v39 = vsel %vm358_vm0, %v1387_v44, %v1389_v40  ;;  %v1392_v19 = vsel %vm358_vm0, %v1389_v40, %v1391_v63  ;;  %v1287_v30 = vpop.permute.xlu0 %1286 }
 0x12d   : > { %v1489_v7 = vsel %vm458_vm1, %v1486_v57, %v1488_v48  ;;  %v1491_v45 = vsel %vm458_vm1, %v1488_v48, %v1490_v61  ;;  %v1755_v20 = vmax.f32 %v1739_v53, 0.0  ;;  %v1424_v36 = vadd.f32 %v1390_v39, %v3355_v0 }
 0x12e   : > { %v1756_v26 = vmax.f32 %v1740_v34, 0.0  ;;  %v1425_v27 = vadd.f32 %v1392_v19, %v1310_v12  ;;  %v1587_v58 = vrot.slane %v1544_v1, 3  ;;  %v1686_v10 = vrot.slane %v1643_v8, 4 }
 0x12f   : > { %v1395_v44 = vrot.slane %v1349_v21, 1  ;;  %v1448_v2 = vmul.f32 %v2716_v51, %v1292_v32  ;;  %v1775_v6 = vmul.f32 %v3438_v14, %v1755_v20  ;;  %v1523_v38 = vadd.f32 %v1489_v7, %v1424_v36 }
 0x130   : > { %v1776_v56 = vmul.f32 %v3438_v14, %v1756_v26  ;;  %v1524_v57 = vadd.f32 %v1491_v45, %v1425_v27  ;;  %v1588_v62 = vsel %vm558_vm2, %v1585_v35, %v1587_v58  ;;  %v1590_v0 = vsel %vm558_vm2, %v1587_v58, %v1589_v59 }
 0x131   : > { %v1687_v12 = vsel %vm658_vm3, %v1684_v52, %v1686_v10  ;;  %v1689_v46 = vsel %vm658_vm3, %v1686_v10, %v1688_v28  ;;  %v1795_v40 = vadd.f32 %v3457_v47, %v1775_v6  ;;  %v1622_v15 = vadd.f32 %v1588_v62, %v1523_v38 }
 0x132   : > { %v1796_v48 = vadd.f32 %v3457_v47, %v1776_v56  ;;  %v1623_v1 = vadd.f32 %v1590_v0, %v1524_v57  ;;  %v1428_v35 = vadd.f32 %v1395_v44, %v1313_v22  ;;  %v1494_v8 = vrot.slane %v1448_v2, 2 }
 0x133   : > { %v1547_v53 = vmul.f32 %v2718_v54, %v1292_v32  ;;  %v1646_v34 = vmul.f32 %v2720_v55, %v1292_v32  ;;  %v1721_v33 = vadd.f32 %v1687_v12, %v1622_v15  ;;  %v1312_v52 = vmul.f32 %v2712_v49, %v1287_v30  ;;  %1811 = vst.msk [vmem:[#allocation2 + $0x4a] sm:$0xff] %vm798_vm5, %v1795_v40 }
 0x134   : > { %v1722_v21 = vadd.f32 %v1689_v46, %v1623_v1  ;;  %v1348_v39 = vmul.f32 %v2714_v50, %v1287_v30  ;;  %1812 = vst.msk [vmem:[#allocation2 + $0x52] sm:$0xff] %vm798_vm5, %v1796_v48  ;;  %v1527_v19 = vadd.f32 %v1494_v8, %v1428_v35  ;;  %v1447_v22 = vmul.f32 %v2716_v51, %v1287_v30  ;;  %v822_v46 = vld [vmem:[#allocation2 + $0x60] ss:$4 sm:$0xff]  ;;  %v842_v35 = vld [vmem:[#allocation2 + $0x62] ss:$4 sm:$0xff] }
 0x135   : > { %v1593_v7 = vrot.slane %v1547_v53, 3  ;;  %v1692_v45 = vrot.slane %v1646_v34, 4  ;;  %v1741_v20 = vadd.f32 %v3412_v31, %v1721_v33  ;;  %v1546_v36 = vmul.f32 %v2718_v54, %v1287_v30 }
 0x136   : > { %v1742_v26 = vadd.f32 %v3412_v31, %v1722_v21  ;;  %v1393_v32 = vrot.slane %v1348_v39, 1  ;;  %v1492_v49 = vrot.slane %v1447_v22, 2  ;;  %v1645_v50 = vmul.f32 %v2720_v55, %v1287_v30  ;;  %v830_v30 = vld [vmem:[#allocation2 + $0x61] ss:$4 sm:$0xff] }
 0x137   : > { %v1626_v27 = vadd.f32 %v1593_v7, %v1527_v19  ;;  %v831_v58 = vmax.f32 %v3226_v29, %v3240_v43  ;;  %v1757_v10 = vmax.f32 %v1741_v20, 0.0  ;;  %v1591_v62 = vrot.slane %v1546_v36, 3 }
 0x138   : > { %v1758_v2 = vmax.f32 %v1742_v26, 0.0  ;;  %v1394_v51 = vsel %vm358_vm0, %v1391_v63, %v1393_v32  ;;  %v1396_v6 = vsel %vm358_vm0, %v1393_v32, %v1395_v44  ;;  %v1493_v54 = vsel %vm458_vm1, %v1490_v61, %v1492_v49 }
 0x139   : > { %v1725_v56 = vadd.f32 %v1692_v45, %v1626_v27  ;;  %v1426_v38 = vadd.f32 %v1394_v51, %v3417_v11  ;;  %v1427_v57 = vadd.f32 %v1396_v6, %v1312_v52  ;;  %v1777_v55 = vmul.f32 %v3438_v14, %v1757_v10 }
 0x13a   : > { %v1778_v29 = vmul.f32 %v3438_v14, %v1758_v2  ;;  %v1495_v43 = vsel %vm458_vm1, %v1492_v49, %v1494_v8  ;;  %v1690_v44 = vrot.slane %v1645_v50, 4  ;;  %v1592_v24 = vsel %vm558_vm2, %v1589_v59, %v1591_v62  ;;  %v854_v8 = vld [vmem:[#allocation2 + $0x63] ss:$4 sm:$0xff]  ;;  %v1818_v50 = vld [vmem:[#allocation2] ss:$4 sm:$0xff] }
 0x13b   : > { %v1745_v3 = vadd.f32 %v3412_v31, %v1725_v56  ;;  %v1525_v63 = vadd.f32 %v1493_v54, %v1426_v38  ;;  %v1526_v0 = vadd.f32 %v1495_v43, %v1427_v57  ;;  %v1797_v12 = vadd.f32 %v3457_v47, %v1777_v55  ;;  %v2502_v54 = vld [vmem:[%s3868_s1 + $0x10] sm:$0xff]  }
 0x13c   : > { %v1798_v11 = vadd.f32 %v3457_v47, %v1778_v29  ;;  %v1594_v61 = vsel %vm558_vm2, %v1591_v62, %v1593_v7  ;;  %v1691_v1 = vsel %vm658_vm3, %v1688_v28, %v1690_v44  ;;  %v1693_v53 = vsel %vm658_vm3, %v1690_v44, %v1692_v45  ;;  %v1819_v29 = vld [vmem:[#allocation2 + $0x20] ss:$4 sm:$0xff]  ;;  %v1823_v43 = vld [vmem:[#allocation2 + $0x21] ss:$4 sm:$0xff] }
 0x13d   : > { %v1761_v40 = vmax.f32 %v1745_v3, 0.0  ;;  %v1624_v48 = vadd.f32 %v1592_v24, %v1525_v63  ;;  %v1625_v15 = vadd.f32 %v1594_v61, %v1526_v0  ;;  %v832_v4 = vmax.f32 %v3328_v16, %v3336_v13  ;;  %1813 = vst.msk [vmem:[#allocation2 + $0x5a] sm:$0xff] %vm798_vm5, %v1797_v12 }
 0x13e   : > { %v833_v59 = vmax.f32 %v3465_v18, %v3473_v17  ;;  %v843_v34 = vmax.f32 %v831_v58, %v3242_v5  ;;  %1814 = vst.msk [vmem:[#allocation2 + $0x62] sm:$0xff] %vm798_vm5, %v1798_v11  ;;  %v834_v21 = vmax.f32 %v822_v46, %v830_v30  ;;  %v1822_v58 = vld [vmem:[#allocation2 + $0x1] ss:$4 sm:$0xff]  ;;  %v1827_v30 = vmax.f32 %v1819_v29, %v1823_v43 }
 0x13f   : > { %v1781_v37 = vmul.f32 %v3438_v14, %v1761_v40  ;;  %v1723_v33 = vadd.f32 %v1691_v1, %v1624_v48  ;;  %v1724_v28 = vadd.f32 %v1693_v53, %v1625_v15  ;;  %v844_v52 = vmax.f32 %v832_v4, %v3338_v41  ;;  %v1830_v40 = vld [vmem:[#allocation2 + $0x2] ss:$4 sm:$0xff]  ;;  %v2503_v53 = vld [vmem:[%s3868_s1 + $0x18] ss:$0 sps:$4 sm:$0xff]  }
 0x140   : > { %v845_v39 = vmax.f32 %v833_v59, %v3475_v23  ;;  %v3569_v16 = vmax.f32 %v843_v34, %v3244_v42  ;;  %v846_v17 = vmax.f32 %v834_v21, %v842_v35  ;;  %v1826_v62 = vmax.f32 %v1818_v50, %v1822_v58  ;;  %v1831_v35 = vld [vmem:[#allocation2 + $0x22] ss:$4 sm:$0xff] }
 0x141   : > { %v1801_v13 = vadd.f32 %v3457_v47, %v1781_v37  ;;  %v1743_v5 = vadd.f32 %v3412_v31, %v1723_v33  ;;  %v1744_v18 = vadd.f32 %v3412_v31, %v1724_v28  ;;  %v3575_v19 = vmax.f32 %v844_v52, %v3340_v9  ;;  %v2501_v9 = vld [vmem:[%s3868_s1 + $0x8] sm:$0xff]  }
 0x142   : > { %v3578_v7 = vmax.f32 %v845_v39, %v3477_v25  ;;  %v3580_v22 = vmax.f32 %v846_v17, %v854_v8  ;;  %v866_v42 = vrot.slane %v3569_v16, 1  ;;  %2329 = vmatprep.subr.bf16.mxu0 %v2501_v9  ;;  %v885_v6 = vrot.slane %v3569_v16, 2  ;;  %v1838_v28 = vld [vmem:[#allocation2 + $0x3] ss:$4 sm:$0xff] }
 0x143   : > { %v1759_v45 = vmax.f32 %v1743_v5, 0.0  ;;  %v1760_v41 = vmax.f32 %v1744_v18, 0.0  ;;  %1817 = vst.msk [vmem:[#allocation2 + $0x7a] sm:$0xf] %vm814_vm6, %v1801_v13  ;;  %v867_v23 = vrot.slane %v3575_v19, 1  ;;  %v886_v49 = vrot.slane %v3575_v19, 2  ;;  %2330 = vmatpush3.bf16.msra.mxu0 %v2501_v9 }
 0x144   : > { %v869_v20 = vrot.slane %v3578_v7, 1  ;;  %v888_v31 = vrot.slane %v3578_v7, 2  ;;  %v871_v32 = vrot.slane %v3580_v22, 1  ;;  %v907_v38 = vrot.slane %v3578_v7, 3  ;;  %v1820_v44 = vld [vmem:[#allocation2 + $0x40] ss:$4 sm:$0xff]  ;;  %2331 = vmatprep.subr.bf16.mxu0 %v2502_v54 }
 0x145   : > { %v1779_v25 = vmul.f32 %v3438_v14, %v1759_v45  ;;  %v1780_v26 = vmul.f32 %v3438_v14, %v1760_v41  ;;  %v868_v36 = vsel %vm358_vm0, %v866_v42, %v867_v23  ;;  %v890_v57 = vrot.slane %v3580_v22, 2  ;;  %v1824_v12 = vld [vmem:[#allocation2 + $0x41] ss:$4 sm:$0xff]  ;;  %v1832_v37 = vld [vmem:[#allocation2 + $0x42] ss:$4 sm:$0xff] }
 0x146   : > { %v870_v27 = vsel %vm358_vm0, %v867_v23, %v869_v20  ;;  %v889_v14 = vsel %vm458_vm1, %v886_v49, %v888_v31  ;;  %v872_v56 = vsel %vm358_vm0, %v869_v20, %v871_v32  ;;  %v905_v55 = vrot.slane %v3575_v19, 3  ;;  %v1839_v39 = vld [vmem:[#allocation2 + $0x23] ss:$4 sm:$0xff] }
 0x147   : > { %v1799_v10 = vadd.f32 %v3457_v47, %v1779_v25  ;;  %v1800_v2 = vadd.f32 %v3457_v47, %v1780_v26  ;;  %v2421_v51 = vpack.i.bf16 %v870_v27, %v868_v36  ;;  %v2426_v47 = vpack.i.bf16 %v871_v32, %v872_v56  ;;  %2332 = vmatpush3.bf16.msra.mxu0 %v2502_v54  ;;  %v1840_v13 = vld [vmem:[#allocation2 + $0x43] ss:$4 sm:$0xff] }
 0x148   : > { %v887_v3 = vsel %vm458_vm1, %v885_v6, %v886_v49  ;;  %v891_v63 = vsel %vm458_vm1, %v888_v31, %v890_v57  ;;  %v909_v0 = vrot.slane %v3580_v22, 3  ;;  %v904_v24 = vrot.slane %v3569_v16, 3  ;;  %2369 = vmatprep.subr.msk.bf16.mxu0 %vm658_vm3, %v2503_v53  ;;  %v3653_v54 = vld [vmem:[%s3868_s1 + $0x8] sm:$0xff]  }
 0x149   : > { %2422 = vrot.lane.b32.xlu0 %v2421_v51, %s2582_s4  ;;  %1815 = vst.msk [vmem:[#allocation2 + $0x6a] sm:$0xff] %vm798_vm5, %v1799_v10  ;;  %1816 = vst.msk [vmem:[#allocation2 + $0x72] sm:$0xff] %vm798_vm5, %v1800_v2  ;;  %v2431_v11 = vpack.i.bf16 %v889_v14, %v887_v3  ;;  %2427 = vrot.lane.b32.xlu1 %v2426_v47, %s2582_s4  ;;  %v908_v61 = vsel %vm558_vm2, %v905_v55, %v907_v38  ;;  %v926_v46 = vrot.slane %v3578_v7, 4 }
 0x14a   : > { %v906_v48 = vsel %vm558_vm2, %v904_v24, %v905_v55  ;;  %v2436_v15 = vpack.i.bf16 %v890_v57, %v891_v63  ;;  %v1828_v1 = vmax.f32 %v1820_v44, %v1824_v12  ;;  %v1834_v8 = vmax.f32 %v1826_v62, %v1830_v40 }
 0x14b   : > { %v924_v4 = vrot.slane %v3575_v19, 4  ;;  %v910_v59 = vsel %vm558_vm2, %v907_v38, %v909_v0  ;;  %v928_v34 = vrot.slane %v3580_v22, 4  ;;  %v1835_v33 = vmax.f32 %v1827_v30, %v1831_v35 }
 0x14c   : > { %v2441_v21 = vpack.i.bf16 %v908_v61, %v906_v48  ;;  %v1836_v52 = vmax.f32 %v1828_v1, %v1832_v37  ;;  %v3626_v5 = vmax.f32 %v1834_v8, %v1838_v28  ;;  %v995_v18 = vsel %vm658_vm3, %v2503_v53, 0 }
 0x14d   : > { %2432 = vrot.lane.b32.xlu0 %v2431_v11, %s2583_s5  ;;  %2437 = vrot.lane.b32.xlu1 %v2436_v15, %s2583_s5  ;;  %v923_v17 = vrot.slane %v3569_v16, 4  ;;  %v927_v45 = vsel %vm658_vm3, %v924_v4, %v926_v46  ;;  %v3632_v41 = vmax.f32 %v1835_v33, %v1839_v39  ;;  %v2446_v20 = vpack.i.bf16 %v909_v0, %v910_v59 }
 0x14e   : > { %2334 = vmatpush3.bf16.msra.mxu0 %v995_v18  ;;  %v3635_v31 = vmax.f32 %v1836_v52, %v1840_v13  ;;  %v929_v26 = vsel %vm658_vm3, %v926_v46, %v928_v34  ;;  %v1853_v49 = vrot.slane %v3626_v5, 1  ;;  %v1872_v29 = vrot.slane %v3626_v5, 2 }
 0x14f   : > { %v925_v25 = vsel %vm658_vm3, %v923_v17, %v924_v4  ;;  %v1854_v32 = vrot.slane %v3632_v41, 1  ;;  %v2456_v51 = vpack.i.bf16 %v928_v34, %v929_v26  ;;  %v1873_v57 = vrot.slane %v3632_v41, 2  ;;  %2349 = vmatprep.subr.bf16.mxu0 %v3653_v54 }
 0x150   : > { %v1821_v42 = vld [vmem:[#allocation2 + $0x60] ss:$4 sm:$0xff]  ;;  %v1825_v23 = vld [vmem:[#allocation2 + $0x61] ss:$4 sm:$0xff]  ;;  %v1833_v36 = vld [vmem:[#allocation2 + $0x62] ss:$4 sm:$0xff]  ;;  %v2451_v27 = vpack.i.bf16 %v927_v45, %v925_v25 }
 0x151   : > { %2442 = vrot.lane.b32.xlu0 %v2441_v21, %s2584_s8  ;;  %v1829_v9 = vmax.f32 %v1821_v42, %v1825_v23  ;;  %2447 = vrot.lane.b32.xlu1 %v2446_v20, %s2584_s8  ;;  %v1856_v50 = vrot.slane %v3635_v31, 1  ;;  %v1875_v10 = vrot.slane %v3635_v31, 2  ;;  %v1841_v2 = vld [vmem:[#allocation2 + $0x63] ss:$4 sm:$0xff]  ;;  %v1855_v6 = vsel %vm358_vm0, %v1853_v49, %v1854_v32 }
 0x152   : > { %v1894_v62 = vrot.slane %v3635_v31, 3  ;;  %v1874_v63 = vsel %vm458_vm1, %v1872_v29, %v1873_v57  ;;  %v1892_v44 = vrot.slane %v3632_v41, 3  ;;  %v1891_v61 = vrot.slane %v3626_v5, 3 }
 0x153   : > { %v1837_v58 = vmax.f32 %v1829_v9, %v1833_v36  ;;  %v1857_v14 = vsel %vm358_vm0, %v1854_v32, %v1856_v50  ;;  %v1876_v43 = vsel %vm458_vm1, %v1873_v57, %v1875_v10  ;;  %v1913_v30 = vrot.slane %v3635_v31, 4 }
 0x154   : > { %v2461_v38 = vpack.i.bf16 %v1857_v14, %v1855_v6  ;;  %v2471_v12 = vpack.i.bf16 %v1876_v43, %v1874_v63  ;;  %v1895_v46 = vsel %vm558_vm2, %v1892_v44, %v1894_v62  ;;  %v1893_v40 = vsel %vm558_vm2, %v1891_v61, %v1892_v44 }
 0x155   : > { %2452 = vrot.lane.b32.xlu0 %v2451_v27, %s2585_s9  ;;  %v3647_v56 = vmax.f32 %v1837_v58, %v1841_v2  ;;  %2457 = vrot.lane.b32.xlu1 %v2456_v51, %s2585_s9  ;;  %v1911_v15 = vrot.slane %v3632_v41, 4  ;;  %v2481_v1 = vpack.i.bf16 %v1895_v46, %v1893_v40  ;;  %v1910_v53 = vrot.slane %v3626_v5, 4  ;;  %v2505_v46 = vld [vmem:[%s3868_s1 + $0x10] sm:$0xff]  }
 0x157   : > { %v1858_v47 = vrot.slane %v3647_v56, 1  ;;  %v1877_v55 = vrot.slane %v3647_v56, 2  ;;  %v1896_v24 = vrot.slane %v3647_v56, 3  ;;  %v1915_v8 = vrot.slane %v3647_v56, 4 }
 0x158   : > { %v1914_v4 = vsel %vm658_vm3, %v1911_v15, %v1913_v30  ;;  %v1912_v59 = vsel %vm658_vm3, %v1910_v53, %v1911_v15 }
 0x159   : > { %2462 = vrot.lane.b32.xlu0 %v2461_v38, %s2582_s4  ;;  %v1859_v3 = vsel %vm358_vm0, %v1856_v50, %v1858_v47  ;;  %v1878_v11 = vsel %vm458_vm1, %v1875_v10, %v1877_v55  ;;  %v1897_v35 = vsel %vm558_vm2, %v1894_v62, %v1896_v24  ;;  %v2491_v37 = vpack.i.bf16 %v1914_v4, %v1912_v59 }
 0x15a   : > { %v2466_v0 = vpack.i.bf16 %v1858_v47, %v1859_v3  ;;  %v2476_v48 = vpack.i.bf16 %v1877_v55, %v1878_v11  ;;  %v2486_v34 = vpack.i.bf16 %v1896_v24, %v1897_v35  ;;  %v1916_v33 = vsel %vm658_vm3, %v1913_v30, %v1915_v8 }
 0x15b   : > { %v2496_v28 = vpack.i.bf16 %v1915_v8, %v1916_v33  ;;  %vm1179_vm0 = vcmask 259072  }
 0x15c   : > { %2467 = vrot.lane.b32.xlu1 %v2466_v0, %s2582_s4 }
 0x15d   : > { %2472 = vrot.lane.b32.xlu0 %v2471_v12, %s2583_s5 }
 0x160   : > { %2477 = vrot.lane.b32.xlu1 %v2476_v48, %s2583_s5  ;;  %v2506_v48 = vld [vmem:[%s3868_s1 + $0x18] ss:$0 sps:$4 sm:$0xff]  }
 0x161   : > { %2482 = vrot.lane.b32.xlu0 %v2481_v1, %s2584_s8  ;;  %v1978_v33 = vsel %vm658_vm3, %v2506_v48, 0 }
 0x164   : > { %2487 = vrot.lane.b32.xlu1 %v2486_v34, %s2584_s8  ;;  %s166_s8 = scalar_lea.vmem [#allocation5], %s2247_s7 }
 0x165   : > { %2492 = vrot.lane.b32.xlu0 %v2491_v37, %s2585_s9  ;;  %s2181_s11 = sshll.u32 %s166_s8, 4  ;;  %s3819_s11 = int_to_ptr.vmem [resolvable:$true] %s2181_s11 }
 0x166   : > { %s2516_s16 = scalar_lea.vmem %s3819_s11, 64 }
 0x167   : > { %p2517_p11 = scmp.ne.s32.totalorder %s3819_s11, %s2516_s16 }
 0x168   : > { %2497 = vrot.lane.b32.xlu1 %v2496_v28, %s2585_s9 }
 0x169   : > { %p2518_p12 = pnand %p2517_p11, %p2648_p5 }
 0x16b   : > { %p2519_p13 = pneg %p2518_p12 }
 0x1bb   : > { %v2423_v21 = vpop.permute.xlu0 %2422  ;;  %v2428_v52 = vpop.permute.xlu1 %2427 }
 0x1bc   : > { %v2425_v18 = vunpack.i.h.bf16 %v2423_v21  ;;  %v2424_v17 = vunpack.i.l.bf16 %v2423_v21  ;;  %v2430_v45 = vunpack.i.h.bf16 %v2428_v52  ;;  %v2429_v42 = vunpack.i.l.bf16 %v2428_v52 }
 0x1be   : > { %v943_v49 = vsel %vm798_vm5, %v3575_v19, %v2425_v18  ;;  %v942_v50 = vsel %vm798_vm5, %v3569_v16, %v2424_v17  ;;  %v945_v58 = vsel %vm798_vm5, %v3580_v22, %v2430_v45  ;;  %v944_v10 = vsel %vm798_vm5, %v3578_v7, %v2429_v42 }
 0x1bf   : > { %v2433_v39 = vpop.permute.xlu0 %2432  ;;  %v2438_v13 = vpop.permute.xlu1 %2437 }
 0x1c0   : > { %v2435_v20 = vunpack.i.h.bf16 %v2433_v39  ;;  %v2434_v9 = vunpack.i.l.bf16 %v2433_v39  ;;  %v2440_v25 = vunpack.i.h.bf16 %v2438_v13  ;;  %v2439_v26 = vunpack.i.l.bf16 %v2438_v13 }
 0x1c2   : > { %v947_v14 = vsel %vm946_vm7, %v942_v50, %v2434_v9  ;;  %v948_v38 = vsel %vm946_vm7, %v943_v49, %v2435_v20  ;;  %v949_v47 = vsel %vm946_vm7, %v944_v10, %v2439_v26  ;;  %v950_v16 = vsel %vm946_vm7, %v945_v58, %v2440_v25 }
 0x1c3   : > { %v2443_v23 = vpop.permute.xlu0 %2442  ;;  %v2448_v27 = vpop.permute.xlu1 %2447 }
 0x1c4   : > { %v2445_v32 = vunpack.i.h.bf16 %v2443_v23  ;;  %v2444_v36 = vunpack.i.l.bf16 %v2443_v23  ;;  %v2450_v2 = vunpack.i.h.bf16 %v2448_v27  ;;  %v2449_v51 = vunpack.i.l.bf16 %v2448_v27 }
 0x1c6   : > { %v952_v29 = vsel %vm951_vm8, %v947_v14, %v2444_v36  ;;  %v953_v22 = vsel %vm951_vm8, %v948_v38, %v2445_v32  ;;  %v954_v63 = vsel %vm951_vm8, %v949_v47, %v2449_v51  ;;  %v955_v0 = vsel %vm951_vm8, %v950_v16, %v2450_v2  ;;  %v2507_v38 = vld [vmem:[%s3868_s1 + $0x20] sm:$0xff]  }
 0x1c7   : > { %v2453_v6 = vpop.permute.xlu0 %2452  ;;  %v2458_v55 = vpop.permute.xlu1 %2457  ;;  %v2254_v47 = vld [vmem:[%s3869_s2 + $0x3] ss:$0 sm:$0xff] }
 0x1c8   : > { %v2455_v57 = vunpack.i.h.bf16 %v2453_v6  ;;  %v2454_v19 = vunpack.i.l.bf16 %v2453_v6  ;;  %v2460_v43 = vunpack.i.h.bf16 %v2458_v55  ;;  %v2459_v7 = vunpack.i.l.bf16 %v2458_v55 }
 0x1ca   : > { %v957_v62 = vsel %vm956_vm9, %v952_v29, %v2454_v19  ;;  %v958_v3 = vsel %vm956_vm9, %v953_v22, %v2455_v57  ;;  %v959_v11 = vsel %vm956_vm9, %v954_v63, %v2459_v7  ;;  %v960_v24 = vsel %vm956_vm9, %v955_v0, %v2460_v43  ;;  %v2508_v19 = vld [vmem:[%s3868_s1 + $0x28] sm:$0xff]   ;;  %v2260_v22 = vld [vmem:[%s3869_s2 + $0x4] ss:$0 sm:$0xff]  ;;  %v2261_v0 = vld [vmem:[%s3869_s2 + $0x5] ss:$0 sm:$0xff] }
 0x1cb   : > { %v961_v44 = vpack.c.bf16 %v958_v3, %v957_v62  ;;  %v2463_v12 = vpop.permute.xlu0 %2462  ;;  %v962_v61 = vpack.c.bf16 %v960_v24, %v959_v11  ;;  %v2586_v57 = vmov 0.0  }
 0x1cc   : > { %v2465_v15 = vunpack.i.h.bf16 %v2463_v12  ;;  %v2464_v1 = vunpack.i.l.bf16 %v2463_v12  ;;  %2339 = vmatprep.subr.bf16.mxu1 %v2586_v57  ;;  %2345 = vmatprep.mubr.msk.bf16.mxu1 %vm2587_vm13, %v2586_v57 }
 0x1cd   : > { %2335 = vmatprep.mubr.msk.bf16.mxu0 %vm987_vm10, %v961_v44  ;;  %2340 = vmatpush3.bf16.msra.mxu1 %v2507_v38 }
 0x1ce   : > { %v2468_v30 = vpop.permute.xlu1 %2467  ;;  %2336 = vmatmul.mubr.msk.bf16.vlgmr.msra.gmra.mrb[0].mxu0 %vm987_vm10, %v962_v61  ;;  %v1929_v28 = vsel %vm798_vm5, %v3626_v5, %v2464_v1  ;;  %2341 = vmatprep.subr.bf16.mxu1 %v2586_v57 }
 0x1cf   : > { %v2473_v40 = vpop.permute.xlu0 %2472  ;;  %2350 = vmatpush3.bf16.msra.mxu0 %v3653_v54  ;;  %v2469_v59 = vunpack.i.l.bf16 %v2468_v30  ;;  %v1930_v54 = vsel %vm798_vm5, %v3632_v41, %v2465_v15  ;;  %v2470_v21 = vunpack.i.h.bf16 %v2468_v30 }
 0x1d0   : > { %2351 = vmatprep.subr.bf16.mxu0 %v2505_v46  ;;  %v2475_v8 = vunpack.i.h.bf16 %v2473_v40  ;;  %v2474_v53 = vunpack.i.l.bf16 %v2473_v40 }
 0x1d1   : > { %v1931_v41 = vsel %vm798_vm5, %v3635_v31, %v2469_v59  ;;  %v1932_v26 = vsel %vm798_vm5, %v3647_v56, %v2470_v21  ;;  %2342 = vmatpush3.bf16.msra.mxu1 %v2508_v19 }
 0x1d2   : > { %v2478_v35 = vpop.permute.xlu1 %2477  ;;  %v1933_v13 = vsel %vm946_vm7, %v1929_v28, %v2474_v53  ;;  %v1934_v18 = vsel %vm946_vm7, %v1930_v54, %v2475_v8  ;;  %2343 = vmatprep.subr.bf16.mxu1 %v2586_v57  ;;  %v2509_v53 = vld [vmem:[%s3868_s1 + $0x30] sm:$0xff]  }
 0x1d3   : > { %v2483_v4 = vpop.permute.xlu0 %2482  ;;  %2352 = vmatpush3.bf16.msra.mxu0 %v2505_v46  ;;  %v2479_v52 = vunpack.i.l.bf16 %v2478_v35  ;;  %v2480_v17 = vunpack.i.h.bf16 %v2478_v35 }
 0x1d4   : > { %v2485_v34 = vunpack.i.h.bf16 %v2483_v4  ;;  %v2484_v37 = vunpack.i.l.bf16 %v2483_v4  ;;  %2370 = vmatprep.subr.msk.bf16.mxu0 %vm658_vm3, %v2506_v48 }
 0x1d5   : > { %v1935_v32 = vsel %vm946_vm7, %v1931_v41, %v2479_v52  ;;  %v1936_v50 = vsel %vm946_vm7, %v1932_v26, %v2480_v17  ;;  %2344 = vmatpush3.bf16.msra.mxu1 %v2509_v53 }
 0x1d6   : > { %v2488_v39 = vpop.permute.xlu1 %2487  ;;  %v1937_v25 = vsel %vm951_vm8, %v1933_v13, %v2484_v37  ;;  %v1938_v5 = vsel %vm951_vm8, %v1934_v18, %v2485_v34  ;;  %2359 = vmatprep.subr.bf16.mxu1 %v2586_v57 }
 0x1d7   : > { %v2493_v45 = vpop.permute.xlu0 %2492  ;;  %v2490_v42 = vunpack.i.h.bf16 %v2488_v39  ;;  %v2489_v23 = vunpack.i.l.bf16 %v2488_v39  ;;  %2354 = vmatpush3.bf16.msra.mxu0 %v1978_v33 }
 0x1d8   : > { %v2495_v20 = vunpack.i.h.bf16 %v2493_v45  ;;  %v2494_v9 = vunpack.i.l.bf16 %v2493_v45 }
 0x1d9   : > { %v1939_v31 = vsel %vm951_vm8, %v1935_v32, %v2489_v23  ;;  %v1940_v51 = vsel %vm951_vm8, %v1936_v50, %v2490_v42 }
 0x1da   : > { %v1941_v36 = vsel %vm956_vm9, %v1937_v25, %v2494_v9  ;;  %v1942_v27 = vsel %vm956_vm9, %v1938_v5, %v2495_v20  ;;  %v2498_v49 = vpop.permute.xlu1 %2497 }
 0x1db   : > { %v1945_v58 = vpack.c.bf16 %v1942_v27, %v1941_v36  ;;  %v2500_v10 = vunpack.i.h.bf16 %v2498_v49  ;;  %v2499_v2 = vunpack.i.l.bf16 %v2498_v49 }
 0x1dd   : > { %v1943_v6 = vsel %vm956_vm9, %v1939_v31, %v2499_v2  ;;  %v1944_v56 = vsel %vm956_vm9, %v1940_v51, %v2500_v10  ;;  %2355 = vmatprep.mubr.msk.bf16.mxu0 %vm987_vm10, %v1945_v58 }
 0x1de   : > { %v1946_v14 = vpack.c.bf16 %v1944_v56, %v1943_v6 }
 0x1e0   : > { %2356 = vmatmul.mubr.msk.bf16.vlgmr.msra.gmra.mrb[4].mxu0 %vm987_vm10, %v1946_v14 }
 0x2a1   : > { %v2337_v16 = vpop.f32.mrb[0].mxu0 }
 0x2a2   : > { %v1040_v55 = vadd.f32 %v2337_v16, %v2254_v47  ;;  %v1031_v29 = vpop.f32.mrb[1].mxu0 }
 0x2a3   : > { %v1032_v43 = vadd.f32 %v2254_v47, %v1031_v29  ;;  %v2338_v7 = vpop.f32.mrb[2].mxu0 }
 0x2a4   : > { %v1048_v62 = vmax.f32 %v1040_v55, 0.0  ;;  %v1043_v3 = vadd.f32 %v2338_v7, %v2254_v47  ;;  %v1034_v63 = vpop.f32.mrb[3].mxu0  ;;  %v2511_v7 = vld [vmem:[%s3868_s1 + $0x28] sm:$0xff]  }
 0x2a5   : > { %v1046_v44 = vmax.f32 %v1032_v43, 0.0  ;;  %v1035_v12 = vadd.f32 %v2254_v47, %v1034_v63 }
 0x2a6   : > { %v1056_v11 = vmul.f32 %v2260_v22, %v1048_v62  ;;  %v1049_v24 = vmax.f32 %v1043_v3, 0.0  ;;  %v2512_v62 = vld [vmem:[%s3868_s1 + $0x30] sm:$0xff]  }
 0x2a7   : > { %v1054_v61 = vmul.f32 %v2260_v22, %v1046_v44  ;;  %v1047_v46 = vmax.f32 %v1035_v12, 0.0 }
 0x2a8   : > { %v1064_v30 = vadd.f32 %v2261_v0, %v1056_v11  ;;  %v1057_v40 = vmul.f32 %v2260_v22, %v1049_v24  ;;  %v2262_v11 = vld [vmem:[%s3869_s2 + $0x6] ss:$0 sm:$0xff] }
 0x2a9   : > { %v1062_v48 = vadd.f32 %v2261_v0, %v1054_v61  ;;  %v1055_v15 = vmul.f32 %v2260_v22, %v1047_v46  ;;  %v2267_v46 = vld [vmem:[%s3869_s2 + $0x7] ss:$0 sm:$0xff] }
 0x2aa   : > { %1068 = vst.msk [vmem:[#allocation3 + $0x12] sm:$0xff] %vm946_vm7, %v1064_v30  ;;  %v1065_v1 = vadd.f32 %v2261_v0, %v1057_v40 }
 0x2ab   : > { %1066 = vst.msk [vmem:[#allocation3 + $0x2] sm:$0xff] %vm946_vm7, %v1062_v48  ;;  %v1063_v35 = vadd.f32 %v2261_v0, %v1055_v15  ;;  %v2268_v15 = vld [vmem:[%s3869_s2 + $0x8] ss:$0 sm:$0xff] }
 0x2ac   : > { %1070 = vst.msk [vmem:[#allocation3 + $0x1a] sm:$0xf] %vm1069_vm12, %v1065_v1 }
 0x2ad   : > { %1067 = vst.msk [vmem:[#allocation3 + $0xa] sm:$0xff] %vm946_vm7, %v1063_v35 }
 0x2b3   : > { %v2357_v8 = vpop.f32.mrb[4].mxu0 }
 0x2b4   : > { %v2023_v4 = vadd.f32 %v2357_v8, %v2254_v47  ;;  %v2014_v59 = vpop.f32.mrb[5].mxu0  ;;  %v1071_v34 = vld [vmem:[#allocation3] ss:$4 sm:$0xff]  ;;  %v1073_v37 = vld [vmem:[#allocation3 + $0x1] ss:$4 sm:$0xff] }
 0x2b5   : > { %v2015_v33 = vadd.f32 %v2254_v47, %v2014_v59  ;;  %v1074_v54 = vmax.f32 %v1071_v34, %v1073_v37  ;;  %v2358_v21 = vpop.f32.mrb[6].mxu0  ;;  %v1076_v52 = vld [vmem:[#allocation3 + $0x2] ss:$4 sm:$0xff]  ;;  %v1079_v23 = vld [vmem:[#allocation3 + $0x3] ss:$4 sm:$0xff] }
 0x2b6   : > { %v2031_v28 = vmax.f32 %v2023_v4, 0.0  ;;  %v2026_v13 = vadd.f32 %v2358_v21, %v2254_v47  ;;  %v2017_v18 = vpop.f32.mrb[7].mxu0 }
 0x2b7   : > { %v2029_v39 = vmax.f32 %v2015_v33, 0.0  ;;  %v1077_v17 = vmax.f32 %v1074_v54, %v1076_v52  ;;  %v2018_v42 = vadd.f32 %v2254_v47, %v2017_v18 }
 0x2b8   : > { %v2039_v45 = vmul.f32 %v2260_v22, %v2031_v28  ;;  %v2032_v9 = vmax.f32 %v2026_v13, 0.0 }
 0x2b9   : > { %v2037_v20 = vmul.f32 %v2260_v22, %v2029_v39  ;;  %v1080_v41 = vmax.f32 %v1077_v17, %v1079_v23  ;;  %v2030_v5 = vmax.f32 %v2018_v42, 0.0 }
 0x2ba   : > { %v2047_v25 = vadd.f32 %v2261_v0, %v2039_v45  ;;  %v2040_v32 = vmul.f32 %v2260_v22, %v2032_v9 }
 0x2bb   : > { %v2045_v26 = vadd.f32 %v2261_v0, %v2037_v20  ;;  %v1089_v36 = vrot.slane %v1080_v41, 2  ;;  %v1085_v27 = vrot.slane %v1080_v41, 1  ;;  %v2038_v49 = vmul.f32 %v2260_v22, %v2030_v5  ;;  %v2510_v22 = vld [vmem:[%s3868_s1 + $0x20] sm:$0xff]  }
 0x2bc   : > { %2051 = vst.msk [vmem:[#allocation3 + $0x12] sm:$0xff] %vm946_vm7, %v2047_v25  ;;  %v2048_v50 = vadd.f32 %v2261_v0, %v2040_v32 }
 0x2bd   : > { %2049 = vst.msk [vmem:[#allocation3 + $0x2] sm:$0xff] %vm946_vm7, %v2045_v26  ;;  %1090 = vrot.lane.b32.xlu1 %v1089_v36, %s2585_s9  ;;  %1086 = vrot.lane.b32.xlu0 %v1085_v27, %s2583_s5  ;;  %v2046_v58 = vadd.f32 %v2261_v0, %v2038_v49 }
 0x2be   : > { %2052 = vst.msk [vmem:[#allocation3 + $0x1a] sm:$0xf] %vm1069_vm12, %v2048_v50 }
 0x2bf   : > { %2050 = vst.msk [vmem:[#allocation3 + $0xa] sm:$0xff] %vm946_vm7, %v2046_v58 }
 0x2c6   : > { %v2053_v10 = vld [vmem:[#allocation3] ss:$4 sm:$0xff]  ;;  %v2054_v2 = vld [vmem:[#allocation3 + $0x1] ss:$4 sm:$0xff]  ;;  %v2056_v51 = vld [vmem:[#allocation3 + $0x2] ss:$4 sm:$0xff] }
 0x2c7   : > { %v2055_v31 = vmax.f32 %v2053_v10, %v2054_v2  ;;  %v2058_v56 = vld [vmem:[#allocation3 + $0x3] ss:$4 sm:$0xff] }
 0x2c9   : > { %v2057_v6 = vmax.f32 %v2055_v31, %v2056_v51 }
 0x2cb   : > { %v2059_v14 = vmax.f32 %v2057_v6, %v2058_v56 }
 0x2cd   : > { %v2068_v38 = vrot.slane %v2059_v14, 2  ;;  %v2064_v19 = vrot.slane %v2059_v14, 1 }
 0x2cf   : > { %2069 = vrot.lane.b32.xlu1 %v2068_v38, %s2585_s9  ;;  %2065 = vrot.lane.b32.xlu0 %v2064_v19, %s2583_s5  ;;  %s2588_s5 = smov [#allocation5]  }
 0x2d0   : > { %s2520_s25 = sshll.u32 %s2588_s5, 4  ;;  %s2521_s25 = int_to_ptr.vmem [resolvable:$false] %s2520_s25 }
 0x2d1   : > { %s2522_s26 = scalar_lea.vmem %s2521_s25, 128  ;;  %p2523_p0 = scmp.lt.s32.totalorder %s3819_s11, %s2521_s25 }
 0x2d2   : > { %p2524_p1 = scmp.lt.s32.totalorder %s2522_s26, %s2516_s16 }
 0x2d4   : > { %p2525_p2 = por %p2524_p1, %p2523_p0 }
 0x2d6   : > { %p2526_p3 = pnand %p2525_p2, %p2519_p13 }
 0x32f   : > { %v1091_v47 = vpop.permute.xlu1 %1090  ;;  %v1087_v16 = vpop.permute.xlu0 %1086 }
 0x330   : > { %v1093_v55 = vsel %vm946_vm7, %v1080_v41, %v1087_v16 }
 0x331   : > { %v1094_v29 = vsel %vm956_vm9, %v1093_v55, %v1091_v47 }
 0x332   : > { %v1095_v43 = vpack.c.bf16 %v1094_v29, %v1094_v29 }
 0x334   : > { %2346 = vmatmul.mubr.msk.bf16.vlgmr.msra.gmra.mrb[0].mxu1 %vm1124_vm14, %v1095_v43 }
 0x335   : > { %2360 = vmatpush3.bf16.msra.mxu1 %v2510_v22  ;;  %2365 = vmatprep.mubr.msk.bf16.mxu1 %vm2587_vm13, %v2586_v57 }
 0x336   : > { %2361 = vmatprep.subr.bf16.mxu1 %v2586_v57 }
 0x339   : > { %2362 = vmatpush3.bf16.msra.mxu1 %v2511_v7 }
 0x33a   : > { %2363 = vmatprep.subr.bf16.mxu1 %v2586_v57 }
 0x33d   : > { %2364 = vmatpush3.bf16.msra.mxu1 %v2512_v62 }
 0x341   : > { %v2070_v3 = vpop.permute.xlu1 %2069  ;;  %v2066_v63 = vpop.permute.xlu0 %2065 }
 0x342   : > { %v2072_v0 = vsel %vm946_vm7, %v2059_v14, %v2066_v63 }
 0x343   : > { %v2073_v44 = vsel %vm956_vm9, %v2072_v0, %v2070_v3 }
 0x344   : > { %v2074_v12 = vpack.c.bf16 %v2073_v44, %v2073_v44 }
 0x346   : > { %2366 = vmatmul.mubr.msk.bf16.vlgmr.msra.gmra.mrb[4].mxu1 %vm1124_vm14, %v2074_v12 }
 0x407   : > { %v1162_v57 = vpop.f32.mrb[0].mxu1 }
 0x408   : > { %v1163_v24 = vadd.f32 %v2262_v11, %v1162_v57  ;;  %v2347_v61 = vpop.f32.mrb[1].mxu1 }
 0x409   : > { %v1165_v30 = vpop.f32.mrb[2].mxu1 }
 0x40a   : > { %v1168_v40 = vmax.f32 %v1163_v24, 0.0  ;;  %v2348_v48 = vpop.f32.mrb[3].mxu1 }
 0x40c   : > { %v1173_v60 = vmul.f32 %v2267_v46, %v1168_v40 }
 0x40e   : > { %v1178_v1 = vadd.f32 %v2268_v15, %v1173_v60 }
 0x410   : > { %1180 = vst.msk [vmem:[#allocation4 + $0x2] sm:$0x3f] %vm1179_vm0, %v1178_v1 }
 0x417   : > { %v1181_v35 = vld [vmem:[#allocation4] ss:$4 sm:$0x3]  ;;  %v1183_v8 = vld [vmem:[#allocation4 + $0x1] ss:$4 sm:$0x3] }
 0x418   : > { %v1184_v53 = vmax.f32 %v1181_v35, %v1183_v8  ;;  %v1186_v59 = vld [vmem:[#allocation4 + $0x2] ss:$4 sm:$0x3]  ;;  %v1189_v28 = vld [vmem:[#allocation4 + $0x3] ss:$4 sm:$0x3] }
 0x419   : > { %v2140_v4 = vpop.f32.mrb[4].mxu1 }
 0x41a   : > { %v2141_v34 = vadd.f32 %v2262_v11, %v2140_v4  ;;  %v2367_v37 = vpop.f32.mrb[5].mxu1  ;;  %v1187_v33 = vmax.f32 %v1184_v53, %v1186_v59 }
 0x41b   : > { %v2143_v54 = vpop.f32.mrb[6].mxu1 }
 0x41c   : > { %v2146_v21 = vmax.f32 %v2141_v34, 0.0  ;;  %v2368_v52 = vpop.f32.mrb[7].mxu1  ;;  %v1190_v39 = vmax.f32 %v1187_v33, %v1189_v28 }
 0x41e   : > { %v2151_v13 = vmul.f32 %v2267_v46, %v2146_v21  ;;  %1191 = vst.msk [vmem:[%s166_s8] sm:$0x3] %vm182_vm15, %v1190_v39 }
 0x420   : > { %v2156_v18 = vadd.f32 %v2268_v15, %v2151_v13 }
 0x422   : > { %2157 = vst.msk [vmem:[#allocation4 + $0x2] sm:$0x3f] %vm1179_vm0, %v2156_v18 }
 0x429   : > { %v2158_v17 = vld [vmem:[#allocation4] ss:$4 sm:$0x3]  ;;  %v2159_v45 = vld [vmem:[#allocation4 + $0x1] ss:$4 sm:$0x3] }
 0x42a   : > { %v2160_v42 = vmax.f32 %v2158_v17, %v2159_v45  ;;  %v2161_v23 = vld [vmem:[#allocation4 + $0x2] ss:$4 sm:$0x3]  ;;  %v2163_v9 = vld [vmem:[#allocation4 + $0x3] ss:$4 sm:$0x3] }
 0x42c   : > { %v2162_v20 = vmax.f32 %v2160_v42, %v2161_v23 }
 0x42e   : > { %v2164_v41 = vmax.f32 %v2162_v20, %v2163_v9 }
 0x430   : > { %2303 = vst.msk [vmem:[%s166_s8 + $0x2] sm:$0x3] %vm182_vm15, %v2164_v41 }
 0x431   : > { %2529 = shalt.err (!%p2526_p3)
}
 0x432   : > { %s2530_s27 = scalar_lea.hbm %s3817_s20, 64  ;;  %s2534_s30 = scalar_lea.hbm %s3870_s3, 128 }
 0x433   : > { %p2531_p4 = scmp.ne.s32.totalorder %s3817_s20, %s2530_s27  ;;  %p2535_p9 = scmp.lt.u32.totalorder %s3817_s20, %s3870_s3 }
 0x434   : > { %p2536_p10 = scmp.lt.u32.totalorder %s2534_s30, %s2530_s27  ;;  %p2538_p12 = scmp.lt.u32.totalorder %s2530_s27, %s3817_s20 }
 0x435   : > { %p2532_p7 = pnand %p2531_p4, %p2648_p5 }
 0x436   : > { %p2537_p11 = por %p2536_p10, %p2535_p9 }
 0x437   : > { %p2533_p8 = pneg %p2532_p7 }
 0x438   : > { %p2539_p13 = por %p2538_p12, %p2537_p11 }
 0x43a   : > { %p2540_p0 = pnand %p2539_p13, %p2533_p8 }
 0x43c   : > { %2543 = shalt.err (!%p2540_p0)
}
 0x43d   : > { %s2589_s7 = smov 2  }
 0x43e   : > { %2371 = dma.vmem_to_hbm [thread:$0]  (%p2648_p5), %s3819_s11, 64, %s3817_s20, %s3824_s24, %s2585_s9, %s2585_s9, %s2589_s7  }
 0x43f PF: > { %p2377_p1 = scmp.ge.s32.totalorder %s2578_s15, 2  ;;  %s2196_s8 = sand.u32 1, %s2566_s12  }
 0x440   : > { %s2197_s10 = scalar_lea.sflag [#allocation6], %s2196_s8 }
 0x441   : > { %p2374_p2 = pnand %p2377_p1, %p2652_p6 }
 0x443   : > { %2561 = dma.done.wait (!%p2374_p2), %s2197_s10, 64  }
 0x444   : > { %2563 = vsyncadd (!%p2374_p2), %s2197_s10, 4294967232  ;;  %p13_p3 = scmp.ge.s32.totalorder %s2635_s18, 4   ;;  %s3873_s12 = smov %s2570_s13 }
 0x445   : > { %s3874_s13 = smov %s2574_s14  ;;  %s3875_s14 = smov %s2646_s21 }
 0x446   : > { %s3876_s15 = smov %s2635_s18  ;;  %15 = sbr.rel (!%p13_p3) target bundleno = 3 (0x3), region = 90 }
 0x44d   :  { %2202 = vsyncpa [#allocation6], 1 }
 0x44e   :  { %2204 = vsyncpa [#allocation6 + $0x1], 1 }

</bundles_post_ra>
